<compile_context>
chip_gen: v5e
topology: v5e:2x2
jax: 0.10.0
libtpu: 0.0.40
codegen_flags: <defaults>
</compile_context>

<pallas_src>
import functools

import jax
import jax.numpy as jnp
import numpy as np
from jax import lax
from jax.experimental import pallas as pl
from jax.experimental.pallas import tpu as pltpu


# ----------------------------------------------------------------------------
# Pallas kernel: fused 3-D conv (single folded MXU contraction) + bias + ReLU.
#   x_ref    : [nb, Cin, L]            bf16  flattened padded volumes
#   w_ref    : [Cout, kd*kh*kw*Cin]    bf16  folded weight matrix
#   b_ref    : [Cout, 1]               f32
#   mask_ref : [1, ncp]                f32   1.0 on valid cols, 0.0 on junk
#   o_ref    : [nb, Cout, ncp]         bf16  padded-grid output slab
#   rhs_ref  : [kd*kh*kw*Cin, ncp]     bf16  VMEM scratch (staged RHS)
# ----------------------------------------------------------------------------
def _conv3d_relu_kernel(x_ref, w_ref, b_ref, mask_ref, o_ref, rhs_ref, *,
                        nb, cin, kd, kh, kw, stride, fsz, wp, ncp):
    for n in range(nb):                       # static, usually 1..4
        # Stage all kernel-offset slices as one contiguous RHS in VMEM.
        idx = 0
        for i in range(kd):
            for j in range(kh):
                for k in range(kw):
                    start = i * fsz + j * wp + k        # static python int
                    if stride == 1:
                        sl = x_ref[n, :, pl.ds(start, ncp)]
                    else:
                        # TODO(synk): verify/replace this lane-strided read
                        # (not exercised by the demo, which uses stride=1).
                        sl = x_ref[n, :, pl.ds(start, ncp, stride=stride)]
                    rhs_ref[pl.ds(idx * cin, cin), :] = sl
                    idx += 1

        # One MXU contraction: K = kd*kh*kw*Cin instead of 27 K=Cin matmuls.
        acc = jnp.dot(w_ref[...], rhs_ref[...],
                      preferred_element_type=jnp.float32)
        out = jnp.maximum(acc + b_ref[...], 0.0)          # bias + ReLU in f32
        out = jnp.where(mask_ref[...] > 0.0, out, 0.0)    # zero junk columns
        o_ref[n, :, :] = out.astype(o_ref.dtype)


# ----------------------------------------------------------------------------
# ConvBlock3d forward: relu(conv3d(x, w, b)), NCDHW in / NCDHW out.
# ----------------------------------------------------------------------------
def conv_block3d_forward(x, w, b, *, stride, padding, batch_block=1):
    """
    x: [N, Cin, D, H, W], w: [Cout, Cin, kd, kh, kw], b: [Cout].
    Returns relu(conv3d(x, w, b)) in NCDHW (bf16), matching nn.Conv3d + ReLU.
    """
    N, Cin, D, H, W = x.shape
    Cout, _, kd, kh, kw = w.shape
    pd, ph, pw = padding
    s = stride

    Do = (D + 2 * pd - kd) // s + 1
    Ho = (H + 2 * ph - kh) // s + 1
    Wo = (W + 2 * pw - kw) // s + 1
    Dp, Hp, Wp = D + 2 * pd, H + 2 * ph, W + 2 * pw
    fsz = Hp * Wp                        # flattened padded H*W plane
    n_cols = Do * fsz                    # useful columns of the output slab
    ncp = ((n_cols + 127) // 128) * 128  # lane-dense (multiple of 128)
    KKK = kd * kh * kw

    # One jnp.pad: spatial padding + depth slack (so the largest-offset slice
    # of ncp lanes never reads past the flattened block).
    max_start = (kd - 1) * fsz + (kh - 1) * Wp + (kw - 1)
    needed_L = max_start + (ncp - 1) * s + 1
    extra = needed_L - Dp * fsz
    extra_d = (extra + fsz - 1) // fsz if extra > 0 else 0
    L = (Dp + extra_d) * fsz

    xp = jnp.pad(x, ((0, 0), (0, 0), (pd, pd + extra_d), (ph, ph), (pw, pw)))
    xf = xp.reshape(N, Cin, L).astype(jnp.bfloat16)

    # Folded weight matrix: column order = offset-major (i, j, k), then Cin.
    wm = jnp.transpose(w, (0, 2, 3, 4, 1)).reshape(Cout, KKK * Cin)
    wm = wm.astype(jnp.bfloat16)
    bias = b.reshape(Cout, 1).astype(jnp.float32)

    # Static 0/1 mask over the ncp output columns (valid = real output voxel).
    cols = np.arange(ncp)
    valid = (cols < n_cols) & ((cols % fsz) // Wp < Ho) & ((cols % Wp) < Wo)
    mask = jnp.asarray(valid.reshape(1, ncp), dtype=jnp.float32)

    nb = batch_block
    assert N % nb == 0, "batch_block must divide the batch size"

    kernel = functools.partial(
        _conv3d_relu_kernel,
        nb=nb, cin=Cin, kd=kd, kh=kh, kw=kw, stride=s,
        fsz=fsz, wp=Wp, ncp=ncp)

    out = pl.pallas_call(
        kernel,
        out_shape=jax.ShapeDtypeStruct((N, Cout, ncp), jnp.bfloat16),
        grid_spec=pltpu.PrefetchScalarGridSpec(
            num_scalar_prefetch=0,
            grid=(N // nb,),
            in_specs=[
                # nb flattened padded volumes per grid step
                pl.BlockSpec((nb, Cin, L), lambda g: (g, 0, 0)),
                # weights / bias / mask resident across the grid
                pl.BlockSpec((Cout, KKK * Cin), lambda g: (0, 0)),
                pl.BlockSpec((Cout, 1), lambda g: (0, 0)),
                pl.BlockSpec((1, ncp), lambda g: (0, 0)),
            ],
            out_specs=pl.BlockSpec((nb, Cout, ncp), lambda g: (g, 0, 0)),
            scratch_shapes=[pltpu.VMEM((KKK * Cin, ncp), jnp.bfloat16)],
        ),
        compiler_params=pltpu.CompilerParams(
            dimension_semantics=("parallel",),   # v7x: 2 TCs split the batch
            # Tiny blocks here; raise toward ~100 MiB on v5e/v6e (cap ~48-56
            # MiB on v7x) for the large-volume depth-tiled variant.
            vmem_limit_bytes=32 * 1024 * 1024,
        ),
    )(xf, wm, bias, mask)

    # NCDHW for the standalone module: lane crop + reshape + border crop
    # (all on bf16; junk columns are already zero thanks to the in-kernel mask).
    out = out[:, :, :n_cols].reshape(N, Cout, Do, Hp, Wp)[:, :, :, :Ho, :Wo]
    return out


# ----------------------------------------------------------------------------
# Main: deterministic params, small shapes, reference check.
# ----------------------------------------------------------------------------
if __name__ == "__main__":
    # ConvBlock3d(convShape, channelsIn, channelsOut, stride, padding)
    conv_shape = (3, 3, 3)
    channels_in = 4
    channels_out = 8
    stride = 1
    padding = (1, 1, 1)

    key = jax.random.PRNGKey(0)
    k_x, k_w, k_b = jax.random.split(key, 3)

    N, D, H, W = 2, 8, 8, 8
    x = jax.random.normal(k_x, (N, channels_in, D, H, W), dtype=jnp.float32)

    # PyTorch-style uniform init: bound = 1/sqrt(Cin * prod(kernel))
    fan_in = channels_in * conv_shape[0] * conv_shape[1] * conv_shape[2]
    bound = 1.0 / np.sqrt(fan_in)
    w = jax.random.uniform(k_w, (channels_out, channels_in) + conv_shape,
                           minval=-bound, maxval=bound, dtype=jnp.float32)
    b = jax.random.uniform(k_b, (channels_out,),
                           minval=-bound, maxval=bound, dtype=jnp.float32)

    fwd = jax.jit(functools.partial(conv_block3d_forward,
                                    stride=stride, padding=padding))
    out = jax.block_until_ready(fwd(x, w, b))

    # Reference: XLA conv3d + bias + relu in full f32 (PyTorch semantics).
    ref = lax.conv_general_dilated(
        x, w,
        window_strides=(stride,) * 3,
        padding=[(p, p) for p in padding],
        dimension_numbers=("NCDHW", "OIDHW", "NCDHW"),
    )
    ref = jnp.maximum(ref + b.reshape(1, channels_out, 1, 1, 1), 0.0)

    # bf16 inputs/weights/output with f32 accumulation -> loosened tolerance.
    out_f32 = np.asarray(out.astype(jnp.float32))
    np.testing.assert_allclose(out_f32, np.asarray(ref), rtol=2e-2, atol=2e-2)
    print("KERNEL_OK")
</pallas_src>

<mosaic_0001>
module attributes {stable_mosaic.version = 11 : i64} {
  func.func @_conv3d_relu_kernel(%arg0: i32, %arg1: memref<1x4x1200xbf16, #tpu.memory_space<vmem>>, %arg2: memref<8x108xbf16, #tpu.memory_space<vmem>>, %arg3: memref<8x1xf32, #tpu.memory_space<vmem>>, %arg4: memref<1x896xf32, #tpu.memory_space<vmem>>, %arg5: memref<1x8x896xbf16, #tpu.memory_space<vmem>>, %arg6: memref<108x896xbf16, #tpu.memory_space<vmem>>) attributes {dimension_semantics = [#tpu.dimension_semantics<parallel>], iteration_bounds = array<i64: 2>, scalar_prefetch = 0 : i64, scratch_operands = 1 : i64, tpu.core_type = #tpu.core_type<tc>, window_params = [{transform_indices = @transform_0, window_bounds = array<i64: 1, 4, 1200>}, {pipeline_mode = #tpu.pipeline_mode<synchronous>, transform_indices = @transform_1, window_bounds = array<i64: 8, 108>}, {pipeline_mode = #tpu.pipeline_mode<synchronous>, transform_indices = @transform_2, window_bounds = array<i64: 8, 1>}, {pipeline_mode = #tpu.pipeline_mode<synchronous>, transform_indices = @transform_3, window_bounds = array<i64: 1, 896>}, {transform_indices = @transform_4, window_bounds = array<i64: 1, 8, 896>}]} {
    %c0 = arith.constant 0 : index
    %c0_0 = arith.constant 0 : index
    %c0_1 = arith.constant 0 : index
    %0 = vector.load %arg1[%c0, %c0_0, %c0_1] : memref<1x4x1200xbf16, #tpu.memory_space<vmem>>, vector<1x4x896xbf16>
    %1 = vector.shape_cast %0 : vector<1x4x896xbf16> to vector<4x896xbf16>
    %c0_2 = arith.constant 0 : index
    %c0_3 = arith.constant 0 : index
    %2 = vector.load %arg6[%c0_2, %c0_3] : memref<108x896xbf16, #tpu.memory_space<vmem>>, vector<4x896xbf16>
    tpu.vector_store %arg6[%c0_2, %c0_3], %1 {strides = array<i32>} : memref<108x896xbf16, #tpu.memory_space<vmem>>, vector<4x896xbf16>,
    %c0_4 = arith.constant 0 : index
    %c0_5 = arith.constant 0 : index
    %c1 = arith.constant 1 : index
    %3 = vector.load %arg1[%c0_4, %c0_5, %c1] : memref<1x4x1200xbf16, #tpu.memory_space<vmem>>, vector<1x4x896xbf16>
    %4 = vector.shape_cast %3 : vector<1x4x896xbf16> to vector<4x896xbf16>
    %c4 = arith.constant 4 : index
    %c0_6 = arith.constant 0 : index
    %5 = vector.load %arg6[%c4, %c0_6] : memref<108x896xbf16, #tpu.memory_space<vmem>>, vector<4x896xbf16>
    tpu.vector_store %arg6[%c4, %c0_6], %4 {strides = array<i32>} : memref<108x896xbf16, #tpu.memory_space<vmem>>, vector<4x896xbf16>,
    %c0_7 = arith.constant 0 : index
    %c0_8 = arith.constant 0 : index
    %c2 = arith.constant 2 : index
    %6 = vector.load %arg1[%c0_7, %c0_8, %c2] : memref<1x4x1200xbf16, #tpu.memory_space<vmem>>, vector<1x4x896xbf16>
    %7 = vector.shape_cast %6 : vector<1x4x896xbf16> to vector<4x896xbf16>
    %c8 = arith.constant 8 : index
    %c0_9 = arith.constant 0 : index
    %8 = vector.load %arg6[%c8, %c0_9] : memref<108x896xbf16, #tpu.memory_space<vmem>>, vector<4x896xbf16>
    tpu.vector_store %arg6[%c8, %c0_9], %7 {strides = array<i32>} : memref<108x896xbf16, #tpu.memory_space<vmem>>, vector<4x896xbf16>,
    %c0_10 = arith.constant 0 : index
    %c0_11 = arith.constant 0 : index
    %c10 = arith.constant 10 : index
    %9 = vector.load %arg1[%c0_10, %c0_11, %c10] : memref<1x4x1200xbf16, #tpu.memory_space<vmem>>, vector<1x4x896xbf16>
    %10 = vector.shape_cast %9 : vector<1x4x896xbf16> to vector<4x896xbf16>
    %c12 = arith.constant 12 : index
    %c0_12 = arith.constant 0 : index
    %11 = vector.load %arg6[%c12, %c0_12] : memref<108x896xbf16, #tpu.memory_space<vmem>>, vector<4x896xbf16>
    tpu.vector_store %arg6[%c12, %c0_12], %10 {strides = array<i32>} : memref<108x896xbf16, #tpu.memory_space<vmem>>, vector<4x896xbf16>,
    %c0_13 = arith.constant 0 : index
    %c0_14 = arith.constant 0 : index
    %c11 = arith.constant 11 : index
    %12 = vector.load %arg1[%c0_13, %c0_14, %c11] : memref<1x4x1200xbf16, #tpu.memory_space<vmem>>, vector<1x4x896xbf16>
    %13 = vector.shape_cast %12 : vector<1x4x896xbf16> to vector<4x896xbf16>
    %c16 = arith.constant 16 : index
    %c0_15 = arith.constant 0 : index
    %14 = vector.load %arg6[%c16, %c0_15] : memref<108x896xbf16, #tpu.memory_space<vmem>>, vector<4x896xbf16>
    tpu.vector_store %arg6[%c16, %c0_15], %13 {strides = array<i32>} : memref<108x896xbf16, #tpu.memory_space<vmem>>, vector<4x896xbf16>,
    %c0_16 = arith.constant 0 : index
    %c0_17 = arith.constant 0 : index
    %c12_18 = arith.constant 12 : index
    %15 = vector.load %arg1[%c0_16, %c0_17, %c12_18] : memref<1x4x1200xbf16, #tpu.memory_space<vmem>>, vector<1x4x896xbf16>
    %16 = vector.shape_cast %15 : vector<1x4x896xbf16> to vector<4x896xbf16>
    %c20 = arith.constant 20 : index
    %c0_19 = arith.constant 0 : index
    %17 = vector.load %arg6[%c20, %c0_19] : memref<108x896xbf16, #tpu.memory_space<vmem>>, vector<4x896xbf16>
    tpu.vector_store %arg6[%c20, %c0_19], %16 {strides = array<i32>} : memref<108x896xbf16, #tpu.memory_space<vmem>>, vector<4x896xbf16>,
    %c0_20 = arith.constant 0 : index
    %c0_21 = arith.constant 0 : index
    %c20_22 = arith.constant 20 : index
    %18 = vector.load %arg1[%c0_20, %c0_21, %c20_22] : memref<1x4x1200xbf16, #tpu.memory_space<vmem>>, vector<1x4x896xbf16>
    %19 = vector.shape_cast %18 : vector<1x4x896xbf16> to vector<4x896xbf16>
    %c24 = arith.constant 24 : index
    %c0_23 = arith.constant 0 : index
    %20 = vector.load %arg6[%c24, %c0_23] : memref<108x896xbf16, #tpu.memory_space<vmem>>, vector<4x896xbf16>
    tpu.vector_store %arg6[%c24, %c0_23], %19 {strides = array<i32>} : memref<108x896xbf16, #tpu.memory_space<vmem>>, vector<4x896xbf16>,
    %c0_24 = arith.constant 0 : index
    %c0_25 = arith.constant 0 : index
    %c21 = arith.constant 21 : index
    %21 = vector.load %arg1[%c0_24, %c0_25, %c21] : memref<1x4x1200xbf16, #tpu.memory_space<vmem>>, vector<1x4x896xbf16>
    %22 = vector.shape_cast %21 : vector<1x4x896xbf16> to vector<4x896xbf16>
    %c28 = arith.constant 28 : index
    %c0_26 = arith.constant 0 : index
    %23 = vector.load %arg6[%c28, %c0_26] : memref<108x896xbf16, #tpu.memory_space<vmem>>, vector<4x896xbf16>
    tpu.vector_store %arg6[%c28, %c0_26], %22 {strides = array<i32>} : memref<108x896xbf16, #tpu.memory_space<vmem>>, vector<4x896xbf16>,
    %c0_27 = arith.constant 0 : index
    %c0_28 = arith.constant 0 : index
    %c22 = arith.constant 22 : index
    %24 = vector.load %arg1[%c0_27, %c0_28, %c22] : memref<1x4x1200xbf16, #tpu.memory_space<vmem>>, vector<1x4x896xbf16>
    %25 = vector.shape_cast %24 : vector<1x4x896xbf16> to vector<4x896xbf16>
    %c32 = arith.constant 32 : index
    %c0_29 = arith.constant 0 : index
    %26 = vector.load %arg6[%c32, %c0_29] : memref<108x896xbf16, #tpu.memory_space<vmem>>, vector<4x896xbf16>
    tpu.vector_store %arg6[%c32, %c0_29], %25 {strides = array<i32>} : memref<108x896xbf16, #tpu.memory_space<vmem>>, vector<4x896xbf16>,
    %c0_30 = arith.constant 0 : index
    %c0_31 = arith.constant 0 : index
    %c100 = arith.constant 100 : index
    %27 = vector.load %arg1[%c0_30, %c0_31, %c100] : memref<1x4x1200xbf16, #tpu.memory_space<vmem>>, vector<1x4x896xbf16>
    %28 = vector.shape_cast %27 : vector<1x4x896xbf16> to vector<4x896xbf16>
    %c36 = arith.constant 36 : index
    %c0_32 = arith.constant 0 : index
    %29 = vector.load %arg6[%c36, %c0_32] : memref<108x896xbf16, #tpu.memory_space<vmem>>, vector<4x896xbf16>
    tpu.vector_store %arg6[%c36, %c0_32], %28 {strides = array<i32>} : memref<108x896xbf16, #tpu.memory_space<vmem>>, vector<4x896xbf16>,
    %c0_33 = arith.constant 0 : index
    %c0_34 = arith.constant 0 : index
    %c101 = arith.constant 101 : index
    %30 = vector.load %arg1[%c0_33, %c0_34, %c101] : memref<1x4x1200xbf16, #tpu.memory_space<vmem>>, vector<1x4x896xbf16>
    %31 = vector.shape_cast %30 : vector<1x4x896xbf16> to vector<4x896xbf16>
    %c40 = arith.constant 40 : index
    %c0_35 = arith.constant 0 : index
    %32 = vector.load %arg6[%c40, %c0_35] : memref<108x896xbf16, #tpu.memory_space<vmem>>, vector<4x896xbf16>
    tpu.vector_store %arg6[%c40, %c0_35], %31 {strides = array<i32>} : memref<108x896xbf16, #tpu.memory_space<vmem>>, vector<4x896xbf16>,
    %c0_36 = arith.constant 0 : index
    %c0_37 = arith.constant 0 : index
    %c102 = arith.constant 102 : index
    %33 = vector.load %arg1[%c0_36, %c0_37, %c102] : memref<1x4x1200xbf16, #tpu.memory_space<vmem>>, vector<1x4x896xbf16>
    %34 = vector.shape_cast %33 : vector<1x4x896xbf16> to vector<4x896xbf16>
    %c44 = arith.constant 44 : index
    %c0_38 = arith.constant 0 : index
    %35 = vector.load %arg6[%c44, %c0_38] : memref<108x896xbf16, #tpu.memory_space<vmem>>, vector<4x896xbf16>
    tpu.vector_store %arg6[%c44, %c0_38], %34 {strides = array<i32>} : memref<108x896xbf16, #tpu.memory_space<vmem>>, vector<4x896xbf16>,
    %c0_39 = arith.constant 0 : index
    %c0_40 = arith.constant 0 : index
    %c110 = arith.constant 110 : index
    %36 = vector.load %arg1[%c0_39, %c0_40, %c110] : memref<1x4x1200xbf16, #tpu.memory_space<vmem>>, vector<1x4x896xbf16>
    %37 = vector.shape_cast %36 : vector<1x4x896xbf16> to vector<4x896xbf16>
    %c48 = arith.constant 48 : index
    %c0_41 = arith.constant 0 : index
    %38 = vector.load %arg6[%c48, %c0_41] : memref<108x896xbf16, #tpu.memory_space<vmem>>, vector<4x896xbf16>
    tpu.vector_store %arg6[%c48, %c0_41], %37 {strides = array<i32>} : memref<108x896xbf16, #tpu.memory_space<vmem>>, vector<4x896xbf16>,
    %c0_42 = arith.constant 0 : index
    %c0_43 = arith.constant 0 : index
    %c111 = arith.constant 111 : index
    %39 = vector.load %arg1[%c0_42, %c0_43, %c111] : memref<1x4x1200xbf16, #tpu.memory_space<vmem>>, vector<1x4x896xbf16>
    %40 = vector.shape_cast %39 : vector<1x4x896xbf16> to vector<4x896xbf16>
    %c52 = arith.constant 52 : index
    %c0_44 = arith.constant 0 : index
    %41 = vector.load %arg6[%c52, %c0_44] : memref<108x896xbf16, #tpu.memory_space<vmem>>, vector<4x896xbf16>
    tpu.vector_store %arg6[%c52, %c0_44], %40 {strides = array<i32>} : memref<108x896xbf16, #tpu.memory_space<vmem>>, vector<4x896xbf16>,
    %c0_45 = arith.constant 0 : index
    %c0_46 = arith.constant 0 : index
    %c112 = arith.constant 112 : index
    %42 = vector.load %arg1[%c0_45, %c0_46, %c112] : memref<1x4x1200xbf16, #tpu.memory_space<vmem>>, vector<1x4x896xbf16>
    %43 = vector.shape_cast %42 : vector<1x4x896xbf16> to vector<4x896xbf16>
    %c56 = arith.constant 56 : index
    %c0_47 = arith.constant 0 : index
    %44 = vector.load %arg6[%c56, %c0_47] : memref<108x896xbf16, #tpu.memory_space<vmem>>, vector<4x896xbf16>
    tpu.vector_store %arg6[%c56, %c0_47], %43 {strides = array<i32>} : memref<108x896xbf16, #tpu.memory_space<vmem>>, vector<4x896xbf16>,
    %c0_48 = arith.constant 0 : index
    %c0_49 = arith.constant 0 : index
    %c120 = arith.constant 120 : index
    %45 = vector.load %arg1[%c0_48, %c0_49, %c120] : memref<1x4x1200xbf16, #tpu.memory_space<vmem>>, vector<1x4x896xbf16>
    %46 = vector.shape_cast %45 : vector<1x4x896xbf16> to vector<4x896xbf16>
    %c60 = arith.constant 60 : index
    %c0_50 = arith.constant 0 : index
    %47 = vector.load %arg6[%c60, %c0_50] : memref<108x896xbf16, #tpu.memory_space<vmem>>, vector<4x896xbf16>
    tpu.vector_store %arg6[%c60, %c0_50], %46 {strides = array<i32>} : memref<108x896xbf16, #tpu.memory_space<vmem>>, vector<4x896xbf16>,
    %c0_51 = arith.constant 0 : index
    %c0_52 = arith.constant 0 : index
    %c121 = arith.constant 121 : index
    %48 = vector.load %arg1[%c0_51, %c0_52, %c121] : memref<1x4x1200xbf16, #tpu.memory_space<vmem>>, vector<1x4x896xbf16>
    %49 = vector.shape_cast %48 : vector<1x4x896xbf16> to vector<4x896xbf16>
    %c64 = arith.constant 64 : index
    %c0_53 = arith.constant 0 : index
    %50 = vector.load %arg6[%c64, %c0_53] : memref<108x896xbf16, #tpu.memory_space<vmem>>, vector<4x896xbf16>
    tpu.vector_store %arg6[%c64, %c0_53], %49 {strides = array<i32>} : memref<108x896xbf16, #tpu.memory_space<vmem>>, vector<4x896xbf16>,
    %c0_54 = arith.constant 0 : index
    %c0_55 = arith.constant 0 : index
    %c122 = arith.constant 122 : index
    %51 = vector.load %arg1[%c0_54, %c0_55, %c122] : memref<1x4x1200xbf16, #tpu.memory_space<vmem>>, vector<1x4x896xbf16>
    %52 = vector.shape_cast %51 : vector<1x4x896xbf16> to vector<4x896xbf16>
    %c68 = arith.constant 68 : index
    %c0_56 = arith.constant 0 : index
    %53 = vector.load %arg6[%c68, %c0_56] : memref<108x896xbf16, #tpu.memory_space<vmem>>, vector<4x896xbf16>
    tpu.vector_store %arg6[%c68, %c0_56], %52 {strides = array<i32>} : memref<108x896xbf16, #tpu.memory_space<vmem>>, vector<4x896xbf16>,
    %c0_57 = arith.constant 0 : index
    %c0_58 = arith.constant 0 : index
    %c200 = arith.constant 200 : index
    %54 = vector.load %arg1[%c0_57, %c0_58, %c200] : memref<1x4x1200xbf16, #tpu.memory_space<vmem>>, vector<1x4x896xbf16>
    %55 = vector.shape_cast %54 : vector<1x4x896xbf16> to vector<4x896xbf16>
    %c72 = arith.constant 72 : index
    %c0_59 = arith.constant 0 : index
    %56 = vector.load %arg6[%c72, %c0_59] : memref<108x896xbf16, #tpu.memory_space<vmem>>, vector<4x896xbf16>
    tpu.vector_store %arg6[%c72, %c0_59], %55 {strides = array<i32>} : memref<108x896xbf16, #tpu.memory_space<vmem>>, vector<4x896xbf16>,
    %c0_60 = arith.constant 0 : index
    %c0_61 = arith.constant 0 : index
    %c201 = arith.constant 201 : index
    %57 = vector.load %arg1[%c0_60, %c0_61, %c201] : memref<1x4x1200xbf16, #tpu.memory_space<vmem>>, vector<1x4x896xbf16>
    %58 = vector.shape_cast %57 : vector<1x4x896xbf16> to vector<4x896xbf16>
    %c76 = arith.constant 76 : index
    %c0_62 = arith.constant 0 : index
    %59 = vector.load %arg6[%c76, %c0_62] : memref<108x896xbf16, #tpu.memory_space<vmem>>, vector<4x896xbf16>
    tpu.vector_store %arg6[%c76, %c0_62], %58 {strides = array<i32>} : memref<108x896xbf16, #tpu.memory_space<vmem>>, vector<4x896xbf16>,
    %c0_63 = arith.constant 0 : index
    %c0_64 = arith.constant 0 : index
    %c202 = arith.constant 202 : index
    %60 = vector.load %arg1[%c0_63, %c0_64, %c202] : memref<1x4x1200xbf16, #tpu.memory_space<vmem>>, vector<1x4x896xbf16>
    %61 = vector.shape_cast %60 : vector<1x4x896xbf16> to vector<4x896xbf16>
    %c80 = arith.constant 80 : index
    %c0_65 = arith.constant 0 : index
    %62 = vector.load %arg6[%c80, %c0_65] : memref<108x896xbf16, #tpu.memory_space<vmem>>, vector<4x896xbf16>
    tpu.vector_store %arg6[%c80, %c0_65], %61 {strides = array<i32>} : memref<108x896xbf16, #tpu.memory_space<vmem>>, vector<4x896xbf16>,
    %c0_66 = arith.constant 0 : index
    %c0_67 = arith.constant 0 : index
    %c210 = arith.constant 210 : index
    %63 = vector.load %arg1[%c0_66, %c0_67, %c210] : memref<1x4x1200xbf16, #tpu.memory_space<vmem>>, vector<1x4x896xbf16>
    %64 = vector.shape_cast %63 : vector<1x4x896xbf16> to vector<4x896xbf16>
    %c84 = arith.constant 84 : index
    %c0_68 = arith.constant 0 : index
    %65 = vector.load %arg6[%c84, %c0_68] : memref<108x896xbf16, #tpu.memory_space<vmem>>, vector<4x896xbf16>
    tpu.vector_store %arg6[%c84, %c0_68], %64 {strides = array<i32>} : memref<108x896xbf16, #tpu.memory_space<vmem>>, vector<4x896xbf16>,
    %c0_69 = arith.constant 0 : index
    %c0_70 = arith.constant 0 : index
    %c211 = arith.constant 211 : index
    %66 = vector.load %arg1[%c0_69, %c0_70, %c211] : memref<1x4x1200xbf16, #tpu.memory_space<vmem>>, vector<1x4x896xbf16>
    %67 = vector.shape_cast %66 : vector<1x4x896xbf16> to vector<4x896xbf16>
    %c88 = arith.constant 88 : index
    %c0_71 = arith.constant 0 : index
    %68 = vector.load %arg6[%c88, %c0_71] : memref<108x896xbf16, #tpu.memory_space<vmem>>, vector<4x896xbf16>
    tpu.vector_store %arg6[%c88, %c0_71], %67 {strides = array<i32>} : memref<108x896xbf16, #tpu.memory_space<vmem>>, vector<4x896xbf16>,
    %c0_72 = arith.constant 0 : index
    %c0_73 = arith.constant 0 : index
    %c212 = arith.constant 212 : index
    %69 = vector.load %arg1[%c0_72, %c0_73, %c212] : memref<1x4x1200xbf16, #tpu.memory_space<vmem>>, vector<1x4x896xbf16>
    %70 = vector.shape_cast %69 : vector<1x4x896xbf16> to vector<4x896xbf16>
    %c92 = arith.constant 92 : index
    %c0_74 = arith.constant 0 : index
    %71 = vector.load %arg6[%c92, %c0_74] : memref<108x896xbf16, #tpu.memory_space<vmem>>, vector<4x896xbf16>
    tpu.vector_store %arg6[%c92, %c0_74], %70 {strides = array<i32>} : memref<108x896xbf16, #tpu.memory_space<vmem>>, vector<4x896xbf16>,
    %c0_75 = arith.constant 0 : index
    %c0_76 = arith.constant 0 : index
    %c220 = arith.constant 220 : index
    %72 = vector.load %arg1[%c0_75, %c0_76, %c220] : memref<1x4x1200xbf16, #tpu.memory_space<vmem>>, vector<1x4x896xbf16>
    %73 = vector.shape_cast %72 : vector<1x4x896xbf16> to vector<4x896xbf16>
    %c96 = arith.constant 96 : index
    %c0_77 = arith.constant 0 : index
    %74 = vector.load %arg6[%c96, %c0_77] : memref<108x896xbf16, #tpu.memory_space<vmem>>, vector<4x896xbf16>
    tpu.vector_store %arg6[%c96, %c0_77], %73 {strides = array<i32>} : memref<108x896xbf16, #tpu.memory_space<vmem>>, vector<4x896xbf16>,
    %c0_78 = arith.constant 0 : index
    %c0_79 = arith.constant 0 : index
    %c221 = arith.constant 221 : index
    %75 = vector.load %arg1[%c0_78, %c0_79, %c221] : memref<1x4x1200xbf16, #tpu.memory_space<vmem>>, vector<1x4x896xbf16>
    %76 = vector.shape_cast %75 : vector<1x4x896xbf16> to vector<4x896xbf16>
    %c100_80 = arith.constant 100 : index
    %c0_81 = arith.constant 0 : index
    %77 = vector.load %arg6[%c100_80, %c0_81] : memref<108x896xbf16, #tpu.memory_space<vmem>>, vector<4x896xbf16>
    tpu.vector_store %arg6[%c100_80, %c0_81], %76 {strides = array<i32>} : memref<108x896xbf16, #tpu.memory_space<vmem>>, vector<4x896xbf16>,
    %c0_82 = arith.constant 0 : index
    %c0_83 = arith.constant 0 : index
    %c222 = arith.constant 222 : index
    %78 = vector.load %arg1[%c0_82, %c0_83, %c222] : memref<1x4x1200xbf16, #tpu.memory_space<vmem>>, vector<1x4x896xbf16>
    %79 = vector.shape_cast %78 : vector<1x4x896xbf16> to vector<4x896xbf16>
    %c104 = arith.constant 104 : index
    %c0_84 = arith.constant 0 : index
    %80 = vector.load %arg6[%c104, %c0_84] : memref<108x896xbf16, #tpu.memory_space<vmem>>, vector<4x896xbf16>
    tpu.vector_store %arg6[%c104, %c0_84], %79 {strides = array<i32>} : memref<108x896xbf16, #tpu.memory_space<vmem>>, vector<4x896xbf16>,
    %c0_85 = arith.constant 0 : index
    %c0_86 = arith.constant 0 : index
    %81 = vector.load %arg2[%c0_85, %c0_86] : memref<8x108xbf16, #tpu.memory_space<vmem>>, vector<8x108xbf16>
    %c0_87 = arith.constant 0 : index
    %c0_88 = arith.constant 0 : index
    %82 = vector.load %arg6[%c0_87, %c0_88] : memref<108x896xbf16, #tpu.memory_space<vmem>>, vector<108x896xbf16>
    %cst = arith.constant dense<0.000000e+00> : vector<8x896xf32>
    %83 = tpu.matmul %81, %82, %cst {dimension_numbers = #tpu.dot_dimension_numbers<[1], [0], [0], [1], [0, 0, 1, 1], [], []>} : vector<8x108xbf16>, vector<108x896xbf16>, vector<8x896xf32> -> vector<8x896xf32>
    %c0_89 = arith.constant 0 : index
    %c0_90 = arith.constant 0 : index
    %84 = vector.load %arg3[%c0_89, %c0_90] : memref<8x1xf32, #tpu.memory_space<vmem>>, vector<8x1xf32>
    %85 = vector.broadcast %84 : vector<8x1xf32> to vector<8x896xf32>
    %86 = arith.addf %83, %85 : vector<8x896xf32>
    %cst_91 = arith.constant 0.000000e+00 : f32
    %87 = vector.broadcast %cst_91 : f32 to vector<8x896xf32>
    %88 = arith.maximumf %86, %87 : vector<8x896xf32>
    %c0_92 = arith.constant 0 : index
    %c0_93 = arith.constant 0 : index
    %89 = vector.load %arg4[%c0_92, %c0_93] : memref<1x896xf32, #tpu.memory_space<vmem>>, vector<1x896xf32>
    %cst_94 = arith.constant 0.000000e+00 : f32
    %90 = vector.broadcast %cst_94 : f32 to vector<1x896xf32>
    %91 = arith.cmpf ogt, %89, %90 : vector<1x896xf32>
    %cst_95 = arith.constant 0.000000e+00 : f32
    %92 = vector.shape_cast %91 : vector<1x896xi1> to vector<1x896xi1>
    %93 = vector.broadcast %92 : vector<1x896xi1> to vector<8x896xi1>
    %94 = vector.broadcast %cst_95 : f32 to vector<8x896xf32>
    %95 = arith.select %93, %88, %94 : vector<8x896xi1>, vector<8x896xf32>
    %96 = arith.truncf %95 : vector<8x896xf32> to vector<8x896xbf16>
    %c0_96 = arith.constant 0 : index
    %c0_97 = arith.constant 0 : index
    %c0_98 = arith.constant 0 : index
    %97 = vector.load %arg5[%c0_96, %c0_97, %c0_98] : memref<1x8x896xbf16, #tpu.memory_space<vmem>>, vector<1x8x896xbf16>
    %98 = vector.shape_cast %97 : vector<1x8x896xbf16> to vector<8x896xbf16>
    %99 = vector.shape_cast %96 : vector<8x896xbf16> to vector<1x8x896xbf16>
    tpu.vector_store %arg5[%c0_96, %c0_97, %c0_98], %99 {strides = array<i32>} : memref<1x8x896xbf16, #tpu.memory_space<vmem>>, vector<1x8x896xbf16>,
    return
  }
  func.func @transform_0(%arg0: i32) -> (i32, i32, i32) {
    %c0_i32 = arith.constant 0 : i32
    %c0_i32_0 = arith.constant 0 : i32
    %c0_i32_1 = arith.constant 0 : i32
    return %arg0, %c0_i32, %c0_i32_0 : i32, i32, i32
  }
  func.func @transform_1(%arg0: i32) -> (i32, i32) {
    %c0_i32 = arith.constant 0 : i32
    %c0_i32_0 = arith.constant 0 : i32
    %c0_i32_1 = arith.constant 0 : i32
    return %c0_i32, %c0_i32_0 : i32, i32
  }
  func.func @transform_2(%arg0: i32) -> (i32, i32) {
    %c0_i32 = arith.constant 0 : i32
    %c0_i32_0 = arith.constant 0 : i32
    %c0_i32_1 = arith.constant 0 : i32
    return %c0_i32, %c0_i32_0 : i32, i32
  }
  func.func @transform_3(%arg0: i32) -> (i32, i32) {
    %c0_i32 = arith.constant 0 : i32
    %c0_i32_0 = arith.constant 0 : i32
    %c0_i32_1 = arith.constant 0 : i32
    return %c0_i32, %c0_i32_0 : i32, i32
  }
  func.func @transform_4(%arg0: i32) -> (i32, i32, i32) {
    %c0_i32 = arith.constant 0 : i32
    %c0_i32_0 = arith.constant 0 : i32
    %c0_i32_1 = arith.constant 0 : i32
    return %arg0, %c0_i32, %c0_i32_0 : i32, i32, i32
  }
}

</mosaic_0001>

<bundles_post_ra>
// kernel: conv_block3d_forward.1
= control target key start
LH: loop header
LB: loop body
LE: loop exit
PB: predicated region body
PF: predicated region fallthrough
CT: control target
= control target key end

     0   :  { %s2229_s15 = smov 0   ;;  %s2862_s0 = inlined_call_operand.vmem [shape: bf16[2,4,1200], index: 0, kind: input, shape index: {}]   ;;  %s2863_s1 = inlined_call_operand.vmem [shape: bf16[8,108], index: 1, kind: input, shape index: {}]   ;;  %s2864_s2 = inlined_call_operand.vmem [shape: f32[8,1], index: 2, kind: input, shape index: {}]   ;;  %s2865_s3 = inlined_call_operand.vmem [shape: f32[1,896], index: 3, kind: input, shape index: {}]   ;;  %s2866_s4 = inlined_call_operand.vmem [shape: bf16[2,8,896], index: 4, kind: output, shape index: {}]  }
   0x1 LB: > { %s1869_s16 = sadd.s32 4294967295, %s2175_s15   ;;  %p1873_p0 = scmp.ge.s32.totalorder %s2175_s15, 1  ;;  %s2175_s15 = sphi %s2229_s15, %s14_s15  }
   0x2   : > { %p162_p1 = scmp.lt.s32.totalorder %s2175_s15, 3 }
   0x4   : > { %p163_p2 = pnand %p1873_p0, %p162_p1 }
   0x5   : > { %p188_p3 = scmp.lt.s32.totalorder (!%p163_p2), %s1869_s16, 1  ;;  %s2177_s21 = smov (!%p163_p2), 127  }
   0x6   : > { %166 = sbr.rel (%p163_p2) target bundleno = 589 (0x24d), region = 36  ;;  %s2178_s22 = smov (!%p163_p2), 126  }
   0x7   : > { %s2179_s23 = smov (!%p163_p2), 118   ;;  %s2180_s24 = smov (!%p163_p2), 117  }
   0x8   : > { %s2181_s25 = smov (!%p163_p2), 116   ;;  %s2182_s26 = smov (!%p163_p2), 108  }
   0x9   : > { %s2183_s27 = smov (!%p163_p2), 107   ;;  %s2184_s28 = smov (!%p163_p2), 106  }
   0xa   : > { %s2185_s29 = smov (!%p163_p2), 27   ;;  %s2186_s30 = smov (!%p163_p2), 28  }
   0xb   : > { %s2879_s16 = smov (!%p188_p3, %s1869_s16), 1  ;;  %s2187_s5 = smov 26   ;;  %vm246_vm0 = vcmask 1043456   ;;  %vm291_vm1 = vcmask 1031168   ;;  %vm248_vm2 = vcmask 1039360   ;;  %vm335_vm3 = vcmask 965632  }
   0xc   : > { %s2130_s17 = smul.u32 20, %s2879_s16  ;;  %s2188_s6 = smov 18   ;;  %vm378_vm4 = vcmask 957440   ;;  %vm422_vm5 = vcmask 949248   ;;  %vm2867_vm6 = vcmask 883712   ;;  %vm509_vm7 = vcmask 875520  }
   0xd   : > { %s2189_s7 = smov 17   ;;  %s2190_s8 = smov 16   ;;  %vm639_vm8 = vcmask 220160   ;;  %vm552_vm9 = vcmask 867328   ;;  %vm596_vm10 = vcmask 228352   ;;  %vm683_vm11 = vcmask 211968  }
   0xe   : > { %s2243_s20 = scalar_lea.vmem %s2862_s0, %s2130_s17  ;;  %s2191_s9 = smov 8   ;;  %vm726_vm12 = vcmask 146432   ;;  %vm813_vm13 = vcmask 130048   ;;  %vm770_vm14 = vcmask 138240   ;;  %vm2868_vm15 = vcmask 64512  }
   0xf   : > { %v200_v0 = vld [vmem:[%s2243_s20 + $0x8] sm:$0x3f]  ;;  %v2247_v1 = vld [vmem:[%s2243_s20] sm:$0xff]  ;;  %s2192_s10 = smov 7   ;;  %s2193_s11 = smov 6  }
  0x10   : > { %205 = vst [vmem:[#allocation1 + $0x10] ss:$2 sm:$0xff] %v200_v0  ;;  %v2251_v2 = vld [vmem:[%s2243_s20 + $0x8] sm:$0xff]  ;;  %s2194_s12 = smov 56   ;;  %s2195_s13 = smov 55  }
  0x11   : > { %202 = vst [vmem:[#allocation1] ss:$2 sm:$0xff] %v2247_v1  ;;  %s2196_s14 = smov 54   ;;  %s2197_s17 = smov 46  }
  0x12   : > { %s2198_s18 = smov 45   ;;  %s2199_s19 = smov 44  }
  0x17   : > { %v208_v3 = vld.sshfl [vmem:[#allocation1 + $0x10] sm:$0xff pattern:$0x75643120]  ;;  %v209_v4 = vld.sshfl [vmem:[#allocation1 + $0x18] sm:$0xff pattern:$0x75643120] }
  0x18   : > { %225 = vst [vmem:[#allocation1 + $0x11] ss:$2 sm:$0xff] %v2251_v2  ;;  %v206_v5 = vld.sshfl [vmem:[#allocation1] sm:$0xff pattern:$0x75643120] }
  0x19   : > { %216 = vst [vmem:[#allocation2 + $0x10] sm:$0x33] %v208_v3  ;;  %v207_v6 = vld.sshfl [vmem:[#allocation1 + $0x8] sm:$0xff pattern:$0x75643120] }
  0x1a   : > { %217 = vst [vmem:[#allocation2 + $0x18] sm:$0x3] %v209_v4 }
  0x1b   : > { %222 = vst [vmem:[#allocation1 + $0x1] ss:$2 sm:$0xff] %v2247_v1 }
  0x1c   : > { %214 = vst [vmem:[#allocation2] sm:$0x33] %v206_v5 }
  0x1d   : > { %215 = vst [vmem:[#allocation2 + $0x8] sm:$0x33] %v207_v6 }
  0x1f   : > { %v230_v7 = vld.sshfl [vmem:[#allocation1 + $0x10] sm:$0xff pattern:$0x75643120]  ;;  %v232_v8 = vld.sshfl [vmem:[#allocation1 + $0x18] sm:$0xff pattern:$0x75643120] }
  0x20   : > { %238 = vrot.lane.b32.xlu1 %v230_v7, %s2177_s21  ;;  %269 = vst [vmem:[#allocation1 + $0x10] ss:$2 sm:$0xff] %v2251_v2 }
  0x22   : > { %v226_v9 = vld.sshfl [vmem:[#allocation1] sm:$0xff pattern:$0x75643120]  ;;  %v228_v10 = vld.sshfl [vmem:[#allocation1 + $0x8] sm:$0xff pattern:$0x75643120] }
  0x23   : > { %234 = vrot.lane.b32.xlu0 %v226_v9, %s2177_s21  ;;  %266 = vst [vmem:[#allocation1] ss:$2 sm:$0xff] %v2247_v1 }
  0x27   : > { %v276_v11 = vld.sshfl [vmem:[#allocation1 + $0x18] sm:$0xff pattern:$0x75643120]  ;;  %v274_v12 = vld.sshfl [vmem:[#allocation1 + $0x10] sm:$0xff pattern:$0x75643120] }
  0x28   : > { %240 = vrot.lane.b32.xlu1 %v232_v8, %s2177_s21  ;;  %313 = vst [vmem:[#allocation1 + $0x11] ss:$2 sm:$0xff] %v2251_v2 }
  0x2a   : > { %v270_v13 = vld.sshfl [vmem:[#allocation1] sm:$0xff pattern:$0x75643120]  ;;  %v272_v14 = vld.sshfl [vmem:[#allocation1 + $0x8] sm:$0xff pattern:$0x75643120] }
  0x2b   : > { %236 = vrot.lane.b32.xlu0 %v228_v10, %s2177_s21  ;;  %278 = vrot.lane.b32.xlu2 %v270_v13, %s2178_s22  ;;  %310 = vst [vmem:[#allocation1 + $0x1] ss:$2 sm:$0xff] %v2247_v1  ;;  %s2201_s21 = smov 35  }
  0x2f   : > { %v318_v15 = vld.sshfl [vmem:[#allocation1 + $0x10] sm:$0xff pattern:$0x75643120]  ;;  %v320_v16 = vld.sshfl [vmem:[#allocation1 + $0x18] sm:$0xff pattern:$0x75643120] }
  0x30   : > { %284 = vrot.lane.b32.xlu1 %v276_v11, %s2178_s22  ;;  %356 = vst [vmem:[#allocation1 + $0x10] ss:$2 sm:$0xff] %v2251_v2 }
  0x32   : > { %v316_v17 = vld.sshfl [vmem:[#allocation1 + $0x8] sm:$0xff pattern:$0x75643120]  ;;  %v314_v18 = vld.sshfl [vmem:[#allocation1] sm:$0xff pattern:$0x75643120] }
  0x33   : > { %282 = vrot.lane.b32.xlu0 %v274_v12, %s2178_s22  ;;  %280 = vrot.lane.b32.xlu2 %v272_v14, %s2178_s22  ;;  %353 = vst [vmem:[#allocation1] ss:$2 sm:$0xff] %v2247_v1  ;;  %s2202_s22 = smov 34  }
  0x37   : > { %v361_v19 = vld.sshfl [vmem:[#allocation1 + $0x10] sm:$0xff pattern:$0x75643120]  ;;  %v363_v20 = vld.sshfl [vmem:[#allocation1 + $0x18] sm:$0xff pattern:$0x75643120] }
  0x38   : > { %326 = vrot.lane.b32.xlu1 %v318_v15, %s2179_s23  ;;  %400 = vst [vmem:[#allocation1 + $0x11] ss:$2 sm:$0xff] %v2251_v2 }
  0x3a   : > { %v359_v21 = vld.sshfl [vmem:[#allocation1 + $0x8] sm:$0xff pattern:$0x75643120]  ;;  %v357_v22 = vld.sshfl [vmem:[#allocation1] sm:$0xff pattern:$0x75643120] }
  0x3b   : > { %324 = vrot.lane.b32.xlu0 %v316_v17, %s2179_s23  ;;  %322 = vrot.lane.b32.xlu2 %v314_v18, %s2179_s23  ;;  %397 = vst [vmem:[#allocation1 + $0x1] ss:$2 sm:$0xff] %v2247_v1 }
  0x3f   : > { %v405_v23 = vld.sshfl [vmem:[#allocation1 + $0x10] sm:$0xff pattern:$0x75643120]  ;;  %v407_v24 = vld.sshfl [vmem:[#allocation1 + $0x18] sm:$0xff pattern:$0x75643120] }
  0x40   : > { %367 = vrot.lane.b32.xlu1 %v359_v21, %s2180_s24  ;;  %443 = vst [vmem:[#allocation1 + $0x10] ss:$2 sm:$0xff] %v2251_v2 }
  0x42   : > { %v401_v25 = vld.sshfl [vmem:[#allocation1] sm:$0xff pattern:$0x75643120]  ;;  %v403_v26 = vld.sshfl [vmem:[#allocation1 + $0x8] sm:$0xff pattern:$0x75643120] }
  0x43   : > { %328 = vrot.lane.b32.xlu2 %v320_v16, %s2179_s23  ;;  %365 = vrot.lane.b32.xlu0 %v357_v22, %s2180_s24  ;;  %440 = vst [vmem:[#allocation1] ss:$2 sm:$0xff] %v2247_v1 }
  0x47   : > { %v448_v27 = vld.sshfl [vmem:[#allocation1 + $0x10] sm:$0xff pattern:$0x75643120]  ;;  %v450_v28 = vld.sshfl [vmem:[#allocation1 + $0x18] sm:$0xff pattern:$0x75643120] }
  0x48   : > { %409 = vrot.lane.b32.xlu1 %v401_v25, %s2181_s25  ;;  %487 = vst [vmem:[#allocation1 + $0x11] ss:$2 sm:$0xff] %v2251_v2 }
  0x4a   : > { %v446_v29 = vld.sshfl [vmem:[#allocation1 + $0x8] sm:$0xff pattern:$0x75643120]  ;;  %v444_v30 = vld.sshfl [vmem:[#allocation1] sm:$0xff pattern:$0x75643120] }
  0x4b   : > { %369 = vrot.lane.b32.xlu2 %v361_v19, %s2180_s24  ;;  %371 = vrot.lane.b32.xlu0 %v363_v20, %s2180_s24  ;;  %484 = vst [vmem:[#allocation1 + $0x1] ss:$2 sm:$0xff] %v2247_v1 }
  0x4f   : > { %v492_v31 = vld.sshfl [vmem:[#allocation1 + $0x10] sm:$0xff pattern:$0x75643120]  ;;  %v494_v32 = vld.sshfl [vmem:[#allocation1 + $0x18] sm:$0xff pattern:$0x75643120] }
  0x50   : > { %415 = vrot.lane.b32.xlu1 %v407_v24, %s2181_s25  ;;  %530 = vst [vmem:[#allocation1 + $0x10] ss:$2 sm:$0xff] %v2251_v2 }
  0x52   : > { %v490_v33 = vld.sshfl [vmem:[#allocation1 + $0x8] sm:$0xff pattern:$0x75643120]  ;;  %v488_v34 = vld.sshfl [vmem:[#allocation1] sm:$0xff pattern:$0x75643120] }
  0x53   : > { %413 = vrot.lane.b32.xlu0 %v405_v23, %s2181_s25  ;;  %411 = vrot.lane.b32.xlu2 %v403_v26, %s2181_s25  ;;  %527 = vst [vmem:[#allocation1] ss:$2 sm:$0xff] %v2247_v1 }
  0x57   : > { %v535_v35 = vld.sshfl [vmem:[#allocation1 + $0x10] sm:$0xff pattern:$0x75643120]  ;;  %v2269_v36 = vld.sshfl [vmem:[#allocation1 + $0x18] sm:$0xff pattern:$0x75643120] }
  0x58   : > { %456 = vrot.lane.b32.xlu1 %v448_v27, %s2182_s26  ;;  %574 = vst [vmem:[#allocation1 + $0x11] ss:$2 sm:$0xff] %v2251_v2 }
  0x5a   : > { %v533_v37 = vld.sshfl [vmem:[#allocation1 + $0x8] sm:$0xff pattern:$0x75643120]  ;;  %v2272_v38 = vld.sshfl [vmem:[#allocation1] sm:$0xff pattern:$0x75643120] }
  0x5b   : > { %454 = vrot.lane.b32.xlu0 %v446_v29, %s2182_s26  ;;  %452 = vrot.lane.b32.xlu2 %v444_v30, %s2182_s26  ;;  %571 = vst [vmem:[#allocation1 + $0x1] ss:$2 sm:$0xff] %v2247_v1 }
  0x5f   : > { %v579_v39 = vld.sshfl [vmem:[#allocation1 + $0x10] sm:$0xff pattern:$0x75643120]  ;;  %v2275_v40 = vld.sshfl [vmem:[#allocation1 + $0x18] sm:$0xff pattern:$0x75643120] }
  0x60   : > { %498 = vrot.lane.b32.xlu1 %v490_v33, %s2183_s27  ;;  %617 = vst [vmem:[#allocation1 + $0x10] ss:$2 sm:$0xff] %v2251_v2  ;;  %v2350_v33 = vld [vmem:[%s2243_s20 + $0x2] sm:$0xff] }
  0x62   : > { %v577_v41 = vld.sshfl [vmem:[#allocation1 + $0x8] sm:$0xff pattern:$0x75643120]  ;;  %v2278_v42 = vld.sshfl [vmem:[#allocation1] sm:$0xff pattern:$0x75643120] }
  0x63   : > { %458 = vrot.lane.b32.xlu2 %v450_v28, %s2182_s26  ;;  %496 = vrot.lane.b32.xlu0 %v488_v34, %s2183_s27  ;;  %614 = vst [vmem:[#allocation1] ss:$2 sm:$0xff] %v2247_v1 }
  0x67   : > { %v622_v43 = vld.sshfl [vmem:[#allocation1 + $0x10] sm:$0xff pattern:$0x75643120]  ;;  %v2281_v44 = vld.sshfl [vmem:[#allocation1 + $0x18] sm:$0xff pattern:$0x75643120] }
  0x68   : > { %543 = vrot.lane.b32.xlu1 %v535_v35, %s2184_s28  ;;  %661 = vst [vmem:[#allocation1 + $0x11] ss:$2 sm:$0xff] %v2251_v2 }
  0x6a   : > { %v620_v45 = vld.sshfl [vmem:[#allocation1 + $0x8] sm:$0xff pattern:$0x75643120]  ;;  %v2285_v46 = vld.sshfl [vmem:[#allocation1] sm:$0xff pattern:$0x75643120] }
  0x6b   : > { %500 = vrot.lane.b32.xlu2 %v492_v31, %s2183_s27  ;;  %502 = vrot.lane.b32.xlu0 %v494_v32, %s2183_s27  ;;  %658 = vst [vmem:[#allocation1 + $0x1] ss:$2 sm:$0xff] %v2247_v1 }
  0x6f   : > { %v666_v47 = vld.sshfl [vmem:[#allocation1 + $0x10] sm:$0xff pattern:$0x75643120]  ;;  %v2288_v48 = vld.sshfl [vmem:[#allocation1 + $0x18] sm:$0xff pattern:$0x75643120] }
  0x70   : > { %628 = vrot.lane.b32.xlu1 %v620_v45, %s2185_s29  ;;  %704 = vst [vmem:[#allocation1 + $0x10] ss:$2 sm:$0xff] %v2251_v2 }
  0x72   : > { %v664_v49 = vld.sshfl [vmem:[#allocation1 + $0x8] sm:$0xff pattern:$0x75643120]  ;;  %v2292_v50 = vld.sshfl [vmem:[#allocation1] sm:$0xff pattern:$0x75643120] }
  0x73   : > { %541 = vrot.lane.b32.xlu0 %v533_v37, %s2184_s28  ;;  %585 = vrot.lane.b32.xlu2 %v577_v41, %s2186_s30  ;;  %701 = vst [vmem:[#allocation1] ss:$2 sm:$0xff] %v2247_v1 }
  0x77   : > { %v709_v51 = vld.sshfl [vmem:[#allocation1 + $0x10] sm:$0xff pattern:$0x75643120]  ;;  %v2297_v52 = vld.sshfl [vmem:[#allocation1 + $0x18] sm:$0xff pattern:$0x75643120] }
  0x78   : > { %674 = vrot.lane.b32.xlu1 %v666_v47, %s2187_s5  ;;  %748 = vst [vmem:[#allocation1 + $0x11] ss:$2 sm:$0xff] %v2251_v2 }
  0x7a   : > { %v705_v53 = vld.sshfl [vmem:[#allocation1] sm:$0xff pattern:$0x75643120]  ;;  %v707_v54 = vld.sshfl [vmem:[#allocation1 + $0x8] sm:$0xff pattern:$0x75643120] }
  0x7b   : > { %587 = vrot.lane.b32.xlu0 %v579_v39, %s2186_s30  ;;  %630 = vrot.lane.b32.xlu2 %v622_v43, %s2185_s29  ;;  %745 = vst [vmem:[#allocation1 + $0x1] ss:$2 sm:$0xff] %v2247_v1  ;;  %v2355_v39 = vld [vmem:[%s2243_s20 + $0xa] sm:$0xff]  ;;  %s2200_s20 = smov 36  }
  0x7f   : > { %v753_v55 = vld.sshfl [vmem:[#allocation1 + $0x10] sm:$0xff pattern:$0x75643120]  ;;  %v2304_v56 = vld.sshfl [vmem:[#allocation1 + $0x18] sm:$0xff pattern:$0x75643120] }
  0x80   : > { %717 = vrot.lane.b32.xlu1 %v709_v51, %s2188_s6  ;;  %791 = vst [vmem:[#allocation1 + $0x10] ss:$2 sm:$0xff] %v2251_v2 }
  0x82   : > { %v751_v57 = vld.sshfl [vmem:[#allocation1 + $0x8] sm:$0xff pattern:$0x75643120]  ;;  %v749_v58 = vld.sshfl [vmem:[#allocation1] sm:$0xff pattern:$0x75643120] }
  0x83   : > { %672 = vrot.lane.b32.xlu0 %v664_v49, %s2187_s5  ;;  %713 = vrot.lane.b32.xlu2 %v705_v53, %s2188_s6  ;;  %788 = vst [vmem:[#allocation1] ss:$2 sm:$0xff] %v2247_v1 }
  0x85   : > { %v279_v59 = vpop.permute.xlu2 %278 }
  0x86   : > { %v286_v0 = vrot.slane %v279_v59, 4 }
  0x87   : > { %v796_v60 = vld.sshfl [vmem:[#allocation1 + $0x10] sm:$0xff pattern:$0x75643120]  ;;  %v2311_v61 = vld.sshfl [vmem:[#allocation1 + $0x18] sm:$0xff pattern:$0x75643120] }
  0x88   : > { %835 = vst [vmem:[#allocation1 + $0x11] ss:$2 sm:$0xff] %v2251_v2 }
  0x8a   : > { %v794_v62 = vld.sshfl [vmem:[#allocation1 + $0x8] sm:$0xff pattern:$0x75643120]  ;;  %v792_v63 = vld.sshfl [vmem:[#allocation1] sm:$0xff pattern:$0x75643120] }
  0x8b   : > { %715 = vrot.lane.b32.xlu0 %v707_v54, %s2188_s6  ;;  %759 = vrot.lane.b32.xlu2 %v751_v57, %s2189_s7  ;;  %832 = vst [vmem:[#allocation1 + $0x1] ss:$2 sm:$0xff] %v2247_v1 }
  0x8c   : > { %802 = vrot.lane.b32.xlu1 %v794_v62, %s2190_s8 }
  0x8d   : > { %v2318_v3 = vpop.permute.xlu2 %280 }
  0x8e   : > { %v287_v4 = vrot.slane %v2318_v3, 4 }
  0x8f   : > { %v840_v5 = vld.sshfl [vmem:[#allocation1 + $0x10] sm:$0xff pattern:$0x75643120]  ;;  %v2321_v6 = vld.sshfl [vmem:[#allocation1 + $0x18] sm:$0xff pattern:$0x75643120] }
  0x90   : > { %v290_v7 = vsel %vm246_vm0, %v286_v0, %v287_v4  ;;  %878 = vst [vmem:[#allocation1 + $0x10] ss:$2 sm:$0xff] %v2251_v2 }
  0x91   : > { %v292_v8 = vsel %vm291_vm1, %v279_v59, %v290_v7 }
  0x92   : > { %v239_v9 = vpop.permute.xlu1 %238  ;;  %v836_v10 = vld.sshfl [vmem:[#allocation1] sm:$0xff pattern:$0x75643120]  ;;  %v838_v11 = vld.sshfl [vmem:[#allocation1 + $0x8] sm:$0xff pattern:$0x75643120] }
  0x93   : > { %761 = vrot.lane.b32.xlu0 %v753_v55, %s2189_s7  ;;  %804 = vrot.lane.b32.xlu2 %v796_v60, %s2190_s8  ;;  %875 = vst [vmem:[#allocation1] ss:$2 sm:$0xff] %v2247_v1  ;;  %v244_v19 = vrot.slane %v239_v9, 4 }
  0x94   : > { %800 = vrot.lane.b32.xlu1 %v792_v63, %s2190_s8  ;;  %302 = vst [vmem:[#allocation2 + $0x1c] sm:$0x33] %v292_v8 }
  0x95   : > { %v235_v12 = vpop.permute.xlu0 %234  ;;  %v2332_v13 = vpop.permute.xlu2 %322 }
  0x96   : > { %v242_v24 = vrot.slane %v235_v12, 4 }
  0x97   : > { %v883_v14 = vld.sshfl [vmem:[#allocation1 + $0x10] sm:$0xff pattern:$0x75643120]  ;;  %v2334_v15 = vld.sshfl [vmem:[#allocation1 + $0x18] sm:$0xff pattern:$0x75643120] }
  0x98   : > { %922 = vst [vmem:[#allocation1 + $0x11] ss:$2 sm:$0xff] %v2251_v2 }
  0x9a   : > { %v241_v16 = vpop.permute.xlu1 %240  ;;  %v879_v17 = vld.sshfl [vmem:[#allocation1] sm:$0xff pattern:$0x75643120]  ;;  %v881_v18 = vld.sshfl [vmem:[#allocation1 + $0x8] sm:$0xff pattern:$0x75643120] }
  0x9b   : > { %757 = vrot.lane.b32.xlu0 %v749_v58, %s2189_s7  ;;  %844 = vrot.lane.b32.xlu2 %v836_v10, %s2191_s9  ;;  %v245_v20 = vrot.slane %v241_v16, 4  ;;  %919 = vst [vmem:[#allocation1 + $0x1] ss:$2 sm:$0xff] %v2247_v1  ;;  %v330_v58 = vrot.slane %v2332_v13, 4 }
  0x9c   : > { %848 = vrot.lane.b32.xlu1 %v840_v5, %s2191_s9 }
  0x9d   : > { %v252_v21 = vsel %vm246_vm0, %v244_v19, %v245_v20  ;;  %v254_v22 = vsel %vm248_vm2, %v241_v16, %v245_v20  ;;  %v237_v2 = vpop.permute.xlu0 %236  ;;  %v329_v23 = vpop.permute.xlu2 %328 }
  0x9e   : > { %v253_v25 = vsel %vm248_vm2, %v239_v9, %v252_v21  ;;  %262 = vst [vmem:[#allocation2 + $0x18] sm:$0xc] %v254_v22  ;;  %v243_v26 = vrot.slane %v237_v2, 4  ;;  %v333_v27 = vrot.slane %v329_v23, 4 }
  0x9f   : > { %261 = vst [vmem:[#allocation2 + $0x10] sm:$0xcc] %v253_v25  ;;  %v927_v30 = vld.sshfl [vmem:[#allocation1 + $0x10] sm:$0xff pattern:$0x75643120] }
  0xa0   : > { %v247_v1 = vsel %vm246_vm0, %v242_v24, %v243_v26  ;;  %v250_v28 = vsel %vm246_vm0, %v243_v26, %v244_v19  ;;  %v341_v29 = vsel %vm335_vm3, %v329_v23, %v333_v27  ;;  %v2352_v34 = vld.sshfl [vmem:[#allocation1 + $0x18] sm:$0xff pattern:$0x75643120] }
  0xa1   : > { %v249_v31 = vsel %vm248_vm2, %v235_v12, %v247_v1  ;;  %v251_v32 = vsel %vm248_vm2, %v237_v2, %v250_v28  ;;  %349 = vst [vmem:[#allocation2 + $0x34] sm:$0xc] %v341_v29  ;;  %vm987_vm2 = vcmask 457728  }
  0xa2   : > { %259 = vst [vmem:[#allocation2] sm:$0xcc] %v249_v31  ;;  %v285_v35 = vpop.permute.xlu1 %284  ;;  %v925_v37 = vld.sshfl [vmem:[#allocation1 + $0x8] sm:$0xff pattern:$0x75643120] }
  0xa3   : > { %260 = vst [vmem:[#allocation2 + $0x8] sm:$0xcc] %v251_v32  ;;  %846 = vrot.lane.b32.xlu0 %v838_v11, %s2191_s9  ;;  %887 = vrot.lane.b32.xlu2 %v879_v17, %s2192_s10  ;;  %v289_v41 = vrot.slane %v285_v35, 4  ;;  %v2359_v43 = vld.sshfl [vmem:[#allocation1] sm:$0xff pattern:$0x75643120] }
  0xa4   : > { %891 = vrot.lane.b32.xlu1 %v883_v14, %s2192_s10  ;;  %962 = vst [vmem:[#allocation1] ss:$2 sm:$0xff] %v2350_v33 }
  0xa5   : > { %v297_v45 = vsel %vm291_vm1, %v285_v35, %v289_v41  ;;  %v283_v47 = vpop.permute.xlu0 %282  ;;  %v2364_v49 = vpop.permute.xlu2 %369  ;;  %965 = vst [vmem:[#allocation1 + $0x10] ss:$2 sm:$0xff] %v2355_v39 }
  0xa6   : > { %305 = vst [vmem:[#allocation2 + $0x34] sm:$0x3] %v297_v45  ;;  %v288_v51 = vrot.slane %v283_v47, 4  ;;  %v375_v12 = vrot.slane %v2364_v49, 4 }
  0xa8   : > { %v293_v53 = vsel %vm246_vm0, %v287_v4, %v288_v51  ;;  %v295_v54 = vsel %vm246_vm0, %v288_v51, %v289_v41 }
  0xa9   : > { %v294_v55 = vsel %vm291_vm1, %v2318_v3, %v293_v53  ;;  %v296_v57 = vsel %vm291_vm1, %v283_v47, %v295_v54  ;;  %vm900_vm1 = vcmask 56320  }
  0xaa   : > { %303 = vst [vmem:[#allocation2 + $0x24] sm:$0x33] %v294_v55  ;;  %v327_v59 = vpop.permute.xlu1 %326 }
  0xab   : > { %304 = vst [vmem:[#allocation2 + $0x2c] sm:$0x33] %v296_v57  ;;  %889 = vrot.lane.b32.xlu0 %v881_v18, %s2192_s10  ;;  %933 = vrot.lane.b32.xlu2 %v925_v37, %s2193_s11  ;;  %v968_v60 = vld.sshfl [vmem:[#allocation1 + $0x8] sm:$0xff pattern:$0x75643120]  ;;  %v332_v62 = vrot.slane %v327_v59, 4 }
  0xac   : > { %976 = vrot.lane.b32.xlu1 %v968_v60, %s2194_s12  ;;  %v970_v63 = vld.sshfl [vmem:[#allocation1 + $0x10] sm:$0xff pattern:$0x75643120]  ;;  %v2378_v0 = vld.sshfl [vmem:[#allocation1 + $0x18] sm:$0xff pattern:$0x75643120] }
  0xad   : > { %v339_v3 = vsel %vm246_vm0, %v332_v62, %v333_v27  ;;  %v325_v4 = vpop.permute.xlu0 %324  ;;  %v2381_v5 = vpop.permute.xlu2 %411  ;;  %v966_v7 = vld.sshfl [vmem:[#allocation1] sm:$0xff pattern:$0x75643120]  ;;  %1009 = vst [vmem:[#allocation1 + $0x11] ss:$2 sm:$0xff] %v2355_v39 }
  0xae   : > { %v340_v8 = vsel %vm335_vm3, %v327_v59, %v339_v3  ;;  %v331_v9 = vrot.slane %v325_v4, 4  ;;  %1006 = vst [vmem:[#allocation1 + $0x1] ss:$2 sm:$0xff] %v2350_v33  ;;  %v418_v27 = vrot.slane %v2381_v5, 4 }
  0xaf   : > { %348 = vst [vmem:[#allocation2 + $0x2c] sm:$0xcc] %v340_v8 }
  0xb0   : > { %v334_v10 = vsel %vm246_vm0, %v330_v58, %v331_v9  ;;  %v337_v11 = vsel %vm246_vm0, %v331_v9, %v332_v62 }
  0xb1   : > { %v336_v14 = vsel %vm335_vm3, %v2332_v13, %v334_v10  ;;  %v338_v16 = vsel %vm335_vm3, %v325_v4, %v337_v11  ;;  %vm944_vm3 = vcmask 48128  }
  0xb2   : > { %346 = vst [vmem:[#allocation2 + $0x1c] sm:$0xcc] %v336_v14  ;;  %v368_v17 = vpop.permute.xlu1 %367 }
  0xb3   : > { %347 = vst [vmem:[#allocation2 + $0x24] sm:$0xcc] %v338_v16  ;;  %935 = vrot.lane.b32.xlu0 %v927_v30, %s2193_s11  ;;  %978 = vrot.lane.b32.xlu2 %v970_v63, %s2194_s12  ;;  %v374_v18 = vrot.slane %v368_v17, 4 }
  0xb4   : > { %974 = vrot.lane.b32.xlu1 %v966_v7, %s2194_s12  ;;  %v1014_v19 = vld.sshfl [vmem:[#allocation1 + $0x10] sm:$0xff pattern:$0x75643120]  ;;  %v2395_v20 = vld.sshfl [vmem:[#allocation1 + $0x18] sm:$0xff pattern:$0x75643120] }
  0xb5   : > { %v380_v21 = vsel %vm246_vm0, %v374_v18, %v375_v12  ;;  %v366_v22 = vpop.permute.xlu0 %365  ;;  %v2398_v13 = vpop.permute.xlu2 %452  ;;  %v1010_v2 = vld.sshfl [vmem:[#allocation1] sm:$0xff pattern:$0x75643120]  ;;  %v1012_v23 = vld.sshfl [vmem:[#allocation1 + $0x8] sm:$0xff pattern:$0x75643120] }
  0xb6   : > { %v381_v24 = vsel %vm378_vm4, %v368_v17, %v380_v21  ;;  %v373_v25 = vrot.slane %v366_v22, 4  ;;  %1052 = vst [vmem:[#allocation1 + $0x10] ss:$2 sm:$0xff] %v2355_v39  ;;  %v460_v16 = vrot.slane %v2398_v13, 4 }
  0xb7   : > { %390 = vst [vmem:[#allocation2 + $0x40] sm:$0x33] %v381_v24 }
  0xb8   : > { %v377_v26 = vsel %vm246_vm0, %v373_v25, %v374_v18  ;;  %1049 = vst [vmem:[#allocation1] ss:$2 sm:$0xff] %v2350_v33 }
  0xb9   : > { %v379_v1 = vsel %vm378_vm4, %v366_v22, %v377_v26 }
  0xba   : > { %389 = vst [vmem:[#allocation2 + $0x38] sm:$0x33] %v379_v1  ;;  %v410_v28 = vpop.permute.xlu1 %409 }
  0xbb   : > { %931 = vrot.lane.b32.xlu0 %v2359_v43, %s2193_s11  ;;  %1018 = vrot.lane.b32.xlu2 %v1010_v2, %s2195_s13  ;;  %v417_v29 = vrot.slane %v410_v28, 4 }
  0xbc   : > { %1022 = vrot.lane.b32.xlu1 %v1014_v19, %s2195_s13 }
  0xbd   : > { %v372_v30 = vpop.permute.xlu0 %371  ;;  %v421_v31 = vsel %vm246_vm0, %v417_v29, %v418_v27  ;;  %v459_v32 = vpop.permute.xlu2 %458  ;;  %v1057_v35 = vld.sshfl [vmem:[#allocation1 + $0x10] sm:$0xff pattern:$0x75643120]  ;;  %v1059_v37 = vld.sshfl [vmem:[#allocation1 + $0x18] sm:$0xff pattern:$0x75643120] }
  0xbe   : > { %v376_v41 = vrot.slane %v372_v30, 4  ;;  %v423_v45 = vsel %vm422_vm5, %v410_v28, %v421_v31  ;;  %v463_v47 = vrot.slane %v459_v32, 4  ;;  %1096 = vst [vmem:[#allocation1 + $0x11] ss:$2 sm:$0xff] %v2355_v39 }
  0xbf   : > { %433 = vst [vmem:[#allocation2 + $0x38] sm:$0xcc] %v423_v45  ;;  %v1055_v54 = vld.sshfl [vmem:[#allocation1 + $0x8] sm:$0xff pattern:$0x75643120] }
  0xc0   : > { %v382_v43 = vsel %vm246_vm0, %v375_v12, %v376_v41  ;;  %v384_v51 = vsel %vm378_vm4, %v372_v30, %v376_v41  ;;  %v471_v53 = vsel %vm2867_vm6, %v459_v32, %v463_v47  ;;  %v1053_v57 = vld.sshfl [vmem:[#allocation1] sm:$0xff pattern:$0x75643120] }
  0xc1   : > { %v383_v55 = vsel %vm378_vm4, %v2364_v49, %v382_v43  ;;  %392 = vst [vmem:[#allocation2 + $0x50] sm:$0x3] %v384_v51  ;;  %vm1031_vm4 = vcmask 449536  }
  0xc2   : > { %391 = vst [vmem:[#allocation2 + $0x48] sm:$0x33] %v383_v55  ;;  %v416_v58 = vpop.permute.xlu1 %415 }
  0xc3   : > { %479 = vst [vmem:[#allocation2 + $0x6c] sm:$0x3] %v471_v53  ;;  %1020 = vrot.lane.b32.xlu0 %v1012_v23, %s2195_s13  ;;  %1065 = vrot.lane.b32.xlu2 %v1057_v35, %s2196_s14  ;;  %v420_v59 = vrot.slane %v416_v58, 4 }
  0xc4   : > { %1063 = vrot.lane.b32.xlu1 %v1055_v54, %s2196_s14  ;;  %1093 = vst [vmem:[#allocation1 + $0x1] ss:$2 sm:$0xff] %v2350_v33 }
  0xc5   : > { %v414_v60 = vpop.permute.xlu0 %413  ;;  %v428_v62 = vsel %vm422_vm5, %v416_v58, %v420_v59  ;;  %v2421_v63 = vpop.permute.xlu2 %500  ;;  %v1103_v3 = vld.sshfl [vmem:[#allocation1 + $0x18] sm:$0xff pattern:$0x75643120]  ;;  %v1101_v4 = vld.sshfl [vmem:[#allocation1 + $0x10] sm:$0xff pattern:$0x75643120] }
  0xc6   : > { %v419_v49 = vrot.slane %v414_v60, 4  ;;  %436 = vst [vmem:[#allocation2 + $0x50] sm:$0xc] %v428_v62  ;;  %v506_v26 = vrot.slane %v2421_v63, 4 }
  0xc7   : > { %1139 = vst [vmem:[#allocation1 + $0x10] ss:$2 sm:$0xff] %v2355_v39 }
  0xc8   : > { %v424_v7 = vsel %vm246_vm0, %v418_v27, %v419_v49  ;;  %v426_v8 = vsel %vm246_vm0, %v419_v49, %v420_v59 }
  0xc9   : > { %v425_v9 = vsel %vm422_vm5, %v2381_v5, %v424_v7  ;;  %v427_v10 = vsel %vm422_vm5, %v414_v60, %v426_v8  ;;  %vm1074_vm5 = vcmask 441344  }
  0xca   : > { %434 = vst [vmem:[#allocation2 + $0x40] sm:$0xcc] %v425_v9  ;;  %v457_v11 = vpop.permute.xlu1 %456 }
  0xcb   : > { %435 = vst [vmem:[#allocation2 + $0x48] sm:$0xcc] %v427_v10  ;;  %1067 = vrot.lane.b32.xlu0 %v1059_v37, %s2196_s14  ;;  %1061 = vrot.lane.b32.xlu2 %v1053_v57, %s2196_s14  ;;  %v462_v12 = vrot.slane %v457_v11, 4  ;;  %v1099_v14 = vld.sshfl [vmem:[#allocation1 + $0x8] sm:$0xff pattern:$0x75643120] }
  0xcc   : > { %1109 = vrot.lane.b32.xlu1 %v1101_v4, %s2197_s17  ;;  %v1097_v17 = vld.sshfl [vmem:[#allocation1] sm:$0xff pattern:$0x75643120] }
  0xcd   : > { %v469_v18 = vsel %vm246_vm0, %v462_v12, %v463_v47  ;;  %v455_v19 = vpop.permute.xlu0 %454  ;;  %v2432_v21 = vpop.permute.xlu2 %585  ;;  %1136 = vst [vmem:[#allocation1] ss:$2 sm:$0xff] %v2350_v33 }
  0xce   : > { %v470_v5 = vsel %vm2867_vm6, %v457_v11, %v469_v18  ;;  %v461_v22 = vrot.slane %v455_v19, 4  ;;  %v1146_v2 = vld.sshfl [vmem:[#allocation1 + $0x18] sm:$0xff pattern:$0x75643120] }
  0xcf   : > { %478 = vst [vmem:[#allocation2 + $0x64] sm:$0x33] %v470_v5  ;;  %v1144_v23 = vld.sshfl [vmem:[#allocation1 + $0x10] sm:$0xff pattern:$0x75643120] }
  0xd0   : > { %v464_v24 = vsel %vm246_vm0, %v460_v16, %v461_v22  ;;  %v467_v25 = vsel %vm246_vm0, %v461_v22, %v462_v12  ;;  %1183 = vst [vmem:[#allocation1 + $0x11] ss:$2 sm:$0xff] %v2355_v39 }
  0xd1   : > { %v466_v27 = vsel %vm2867_vm6, %v2398_v13, %v464_v24  ;;  %v468_v1 = vsel %vm2867_vm6, %v455_v19, %v467_v25  ;;  %vm1118_vm6 = vcmask 375808  }
  0xd2   : > { %476 = vst [vmem:[#allocation2 + $0x54] sm:$0x33] %v466_v27  ;;  %v499_v28 = vpop.permute.xlu1 %498 }
  0xd3   : > { %477 = vst [vmem:[#allocation2 + $0x5c] sm:$0x33] %v468_v1  ;;  %1107 = vrot.lane.b32.xlu0 %v1099_v14, %s2197_s17  ;;  %v505_v29 = vrot.slane %v499_v28, 4  ;;  %v592_v1 = vrot.slane %v2432_v21, 4 }
  0xd4   : > { %1111 = vrot.lane.b32.xlu1 %v1103_v3, %s2197_s17  ;;  %v1142_v30 = vld.sshfl [vmem:[#allocation1 + $0x8] sm:$0xff pattern:$0x75643120]  ;;  %v1140_v31 = vld.sshfl [vmem:[#allocation1] sm:$0xff pattern:$0x75643120] }
  0xd5   : > { %1150 = vrot.lane.b32.xlu2 %v1142_v30, %s2198_s18  ;;  %v511_v32 = vsel %vm246_vm0, %v505_v29, %v506_v26  ;;  %v497_v35 = vpop.permute.xlu0 %496  ;;  %v2447_v13 = vpop.permute.xlu2 %630  ;;  %1180 = vst [vmem:[#allocation1 + $0x1] ss:$2 sm:$0xff] %v2350_v33 }
  0xd6   : > { %v512_v37 = vsel %vm509_vm7, %v499_v28, %v511_v32  ;;  %v504_v41 = vrot.slane %v497_v35, 4  ;;  %v636_v4 = vrot.slane %v2447_v13, 4 }
  0xd7   : > { %521 = vst [vmem:[#allocation2 + $0x5c] sm:$0xcc] %v512_v37  ;;  %v1188_v45 = vld.sshfl [vmem:[#allocation1 + $0x10] sm:$0xff pattern:$0x75643120] }
  0xd8   : > { %v508_v47 = vsel %vm246_vm0, %v504_v41, %v505_v29  ;;  %v2452_v43 = vld.sshfl [vmem:[#allocation1 + $0x18] sm:$0xff pattern:$0x75643120] }
  0xd9   : > { %v510_v51 = vsel %vm509_vm7, %v497_v35, %v508_v47  ;;  %1226 = vst [vmem:[#allocation1 + $0x10] ss:$2 sm:$0xff] %v2355_v39 }
  0xda   : > { %520 = vst [vmem:[#allocation2 + $0x54] sm:$0xcc] %v510_v51  ;;  %v2456_v53 = vpop.permute.xlu1 %543 }
  0xdb   : > { %1105 = vrot.lane.b32.xlu0 %v1097_v17, %s2197_s17  ;;  %v549_v16 = vrot.slane %v2456_v53, 4 }
  0xdc   : > { %1148 = vrot.lane.b32.xlu1 %v1140_v31, %s2198_s18  ;;  %v1186_v54 = vld.sshfl [vmem:[#allocation1 + $0x8] sm:$0xff pattern:$0x75643120]  ;;  %v1184_v55 = vld.sshfl [vmem:[#allocation1] sm:$0xff pattern:$0x75643120] }
  0xdd   : > { %1154 = vrot.lane.b32.xlu2 %v1146_v2, %s2198_s18  ;;  %v503_v57 = vpop.permute.xlu0 %502  ;;  %v2461_v58 = vpop.permute.xlu2 %713  ;;  %1223 = vst [vmem:[#allocation1] ss:$2 sm:$0xff] %v2350_v33 }
  0xde   : > { %v507_v59 = vrot.slane %v503_v57, 4 }
  0xe0   : > { %v513_v60 = vsel %vm246_vm0, %v506_v26, %v507_v59  ;;  %v515_v62 = vsel %vm509_vm7, %v503_v57, %v507_v59  ;;  %v1231_v3 = vld.sshfl [vmem:[#allocation1 + $0x10] sm:$0xff pattern:$0x75643120]  ;;  %v1233_v49 = vld.sshfl [vmem:[#allocation1 + $0x18] sm:$0xff pattern:$0x75643120] }
  0xe1   : > { %v514_v7 = vsel %vm509_vm7, %v2421_v63, %v513_v60  ;;  %523 = vst [vmem:[#allocation2 + $0x6c] sm:$0xc] %v515_v62  ;;  %vm1161_vm7 = vcmask 367616  }
  0xe2   : > { %522 = vst [vmem:[#allocation2 + $0x64] sm:$0xcc] %v514_v7  ;;  %v2469_v8 = vpop.permute.xlu1 %628 }
  0xe3   : > { %1152 = vrot.lane.b32.xlu0 %v1144_v23, %s2198_s18  ;;  %v635_v9 = vrot.slane %v2469_v8, 4  ;;  %1270 = vst [vmem:[#allocation1 + $0x11] ss:$2 sm:$0xff] %v2355_v39 }
  0xe4   : > { %1194 = vrot.lane.b32.xlu1 %v1186_v54, %s2199_s19  ;;  %v1229_v10 = vld.sshfl [vmem:[#allocation1 + $0x8] sm:$0xff pattern:$0x75643120]  ;;  %v1227_v11 = vld.sshfl [vmem:[#allocation1] sm:$0xff pattern:$0x75643120] }
  0xe5   : > { %1196 = vrot.lane.b32.xlu2 %v1188_v45, %s2199_s19  ;;  %v2476_v12 = vpop.permute.xlu0 %541  ;;  %v641_v63 = vsel %vm246_vm0, %v635_v9, %v636_v4  ;;  %v2483_v14 = vpop.permute.xlu2 %759  ;;  %1267 = vst [vmem:[#allocation1 + $0x1] ss:$2 sm:$0xff] %v2350_v33  ;;  %v721_v54 = vrot.slane %v2461_v58, 4 }
  0xe6   : > { %v548_v17 = vrot.slane %v2476_v12, 4  ;;  %v642_v18 = vsel %vm639_vm8, %v2469_v8, %v641_v63 }
  0xe7   : > { %651 = vst [vmem:[#allocation2 + $0x94] sm:$0x33] %v642_v18 }
  0xe8   : > { %v554_v19 = vsel %vm246_vm0, %v548_v17, %v549_v16 }
  0xe9   : > { %v555_v5 = vsel %vm552_vm9, %v2476_v12, %v554_v19 }
  0xea   : > { %564 = vst [vmem:[#allocation2 + $0x78] sm:$0x33] %v555_v5  ;;  %v2497_v22 = vpop.permute.xlu1 %674  ;;  %v1277_v2 = vld.sshfl [vmem:[#allocation1 + $0x18] sm:$0xff pattern:$0x75643120] }
  0xeb   : > { %1235 = vrot.lane.b32.xlu0 %v1227_v11, %s2200_s20  ;;  %v1275_v23 = vld.sshfl [vmem:[#allocation1 + $0x10] sm:$0xff pattern:$0x75643120]  ;;  %v680_v32 = vrot.slane %v2497_v22, 4 }
  0xec   : > { %1237 = vrot.lane.b32.xlu1 %v1229_v10, %s2200_s20  ;;  %v1271_v24 = vld.sshfl [vmem:[#allocation1] sm:$0xff pattern:$0x75643120]  ;;  %v1273_v27 = vld.sshfl [vmem:[#allocation1 + $0x8] sm:$0xff pattern:$0x75643120] }
  0xed   : > { %1192 = vrot.lane.b32.xlu2 %v1184_v55, %s2199_s19  ;;  %v2502_v25 = vpop.permute.xlu0 %587  ;;  %v2504_v26 = vpop.permute.xlu2 %804  ;;  %1313 = vst [vmem:[#allocation1 + $0x10] ss:$2 sm:$0xff] %v2355_v39 }
  0xee   : > { %v593_v28 = vrot.slane %v2502_v25, 4  ;;  %1310 = vst [vmem:[#allocation1] ss:$2 sm:$0xff] %v2350_v33  ;;  %v810_v45 = vrot.slane %v2504_v26, 4 }
  0xf0   : > { %v598_v29 = vsel %vm246_vm0, %v592_v1, %v593_v28 }
  0xf1   : > { %v599_v30 = vsel %vm596_vm10, %v2432_v21, %v598_v29 }
  0xf2   : > { %608 = vst [vmem:[#allocation2 + $0x78] sm:$0xcc] %v599_v30  ;;  %v2517_v39 = vpop.permute.xlu1 %717 }
  0xf3   : > { %1281 = vrot.lane.b32.xlu0 %v1273_v27, %s2201_s21  ;;  %v723_v55 = vrot.slane %v2517_v39, 4 }
  0xf4   : > { %1283 = vrot.lane.b32.xlu1 %v1275_v23, %s2201_s21  ;;  %v1318_v7 = vld.sshfl [vmem:[#allocation1 + $0x10] sm:$0xff pattern:$0x75643120]  ;;  %v1320_v63 = vld.sshfl [vmem:[#allocation1 + $0x18] sm:$0xff pattern:$0x75643120] }
  0xf5   : > { %1239 = vrot.lane.b32.xlu2 %v1231_v3, %s2200_s20  ;;  %v2520_v31 = vpop.permute.xlu0 %672  ;;  %v2522_v33 = vpop.permute.xlu2 %844  ;;  %v1316_v19 = vld.sshfl [vmem:[#allocation1 + $0x8] sm:$0xff pattern:$0x75643120] }
  0xf6   : > { %v679_v35 = vrot.slane %v2520_v31, 4 }
  0xf8   : > { %v685_v37 = vsel %vm246_vm0, %v679_v35, %v680_v32 }
  0xf9   : > { %v686_v41 = vsel %vm683_vm11, %v2520_v31, %v685_v37 }
  0xfa   : > { %695 = vst [vmem:[#allocation2 + $0x94] sm:$0xcc] %v686_v41 }
  0xfb   : > { %1285 = vrot.lane.b32.xlu0 %v1277_v2, %s2201_s21  ;;  %v766_v2 = vrot.slane %v2483_v14, 4 }
  0xfc   : > { %1279 = vrot.lane.b32.xlu1 %v1271_v24, %s2201_s21 }
  0xfd   : > { %1241 = vrot.lane.b32.xlu2 %v1233_v49, %s2200_s20  ;;  %v716_v47 = vpop.permute.xlu0 %715  ;;  %v2535_v51 = vpop.permute.xlu2 %887 }
  0xfe   : > { %v722_v57 = vrot.slane %v716_v47, 4  ;;  %v803_v59 = vpop.permute.xlu1 %802 }
  0xff   : > { %v809_v60 = vrot.slane %v803_v59, 4 }
 0x100   : > { %v725_v62 = vsel %vm246_vm0, %v721_v54, %v722_v57  ;;  %v728_v3 = vsel %vm246_vm0, %v722_v57, %v723_v55 }
 0x101   : > { %v727_v49 = vsel %vm726_vm12, %v2461_v58, %v725_v62  ;;  %v729_v10 = vsel %vm726_vm12, %v716_v47, %v728_v3  ;;  %v815_v11 = vsel %vm246_vm0, %v809_v60, %v810_v45  ;;  %v1314_v47 = vld.sshfl [vmem:[#allocation1] sm:$0xff pattern:$0x75643120]  ;;  %v852_v3 = vrot.slane %v2522_v33, 4 }
 0x102   : > { %737 = vst [vmem:[#allocation2 + $0xa8] sm:$0x33] %v727_v49  ;;  %v816_v18 = vsel %vm813_vm13, %v803_v59, %v815_v11 }
 0x103   : > { %738 = vst [vmem:[#allocation2 + $0xb0] sm:$0x33] %v729_v10  ;;  %1326 = vrot.lane.b32.xlu0 %v1318_v7, %s2202_s22 }
 0x104   : > { %825 = vst [vmem:[#allocation2 + $0xcc] sm:$0x33] %v816_v18  ;;  %1328 = vrot.lane.b32.xlu1 %v1320_v63, %s2202_s22 }
 0x105   : > { %1324 = vrot.lane.b32.xlu2 %v1316_v19, %s2202_s22  ;;  %v2550_v5 = vpop.permute.xlu0 %761  ;;  %v2552_v58 = vpop.permute.xlu2 %933 }
 0x106   : > { %v767_v23 = vrot.slane %v2550_v5, 4  ;;  %v801_v24 = vpop.permute.xlu1 %800 }
 0x107   : > { %v808_v27 = vrot.slane %v801_v24, 4 }
 0x108   : > { %v772_v29 = vsel %vm246_vm0, %v766_v2, %v767_v23 }
 0x109   : > { %v812_v30 = vsel %vm246_vm0, %v808_v27, %v809_v60  ;;  %v773_v37 = vsel %vm770_vm14, %v2483_v14, %v772_v29 }
 0x10a   : > { %v814_v41 = vsel %vm813_vm13, %v801_v24, %v812_v30  ;;  %782 = vst [vmem:[#allocation2 + $0xb0] sm:$0xcc] %v773_v37 }
 0x10b   : > { %824 = vst [vmem:[#allocation2 + $0xc4] sm:$0x33] %v814_v41  ;;  %1198 = vrot.lane.b32.xlu0 %v2452_v43, %s2199_s19 }
 0x10c   : > { %539 = vrot.lane.b32.xlu1 %v2272_v38, %s2184_s28 }
 0x10d   : > { %1322 = vrot.lane.b32.xlu2 %v1314_v47, %s2202_s22  ;;  %v758_v54 = vpop.permute.xlu0 %757  ;;  %v2567_v57 = vpop.permute.xlu2 %978 }
 0x10e   : > { %v765_v59 = vrot.slane %v758_v54, 4  ;;  %v2569_v60 = vpop.permute.xlu1 %848  ;;  %v984_v63 = vrot.slane %v2567_v57, 4 }
 0x10f   : > { %v854_v7 = vrot.slane %v2569_v60, 4 }
 0x110   : > { %v769_v14 = vsel %vm246_vm0, %v765_v59, %v766_v2 }
 0x111   : > { %v771_v62 = vsel %vm770_vm14, %v758_v54, %v769_v14  ;;  %v940_v54 = vrot.slane %v2552_v58, 4 }
 0x112   : > { %781 = vst [vmem:[#allocation2 + $0xa8] sm:$0xcc] %v771_v62 }
 0x113   : > { %626 = vrot.lane.b32.xlu0 %v2285_v46, %s2185_s29 }
 0x114   : > { %670 = vrot.lane.b32.xlu1 %v2292_v50, %s2187_s5 }
 0x115   : > { %583 = vrot.lane.b32.xlu2 %v2278_v42, %s2186_s30  ;;  %v847_v38 = vpop.permute.xlu0 %846  ;;  %v2579_v43 = vpop.permute.xlu2 %1018 }
 0x116   : > { %v2583_v49 = vpop.permute.xlu1 %891  ;;  %v853_v10 = vrot.slane %v847_v38, 4 }
 0x117   : > { %v897_v2 = vrot.slane %v2583_v49, 4 }
 0x118   : > { %v856_v11 = vsel %vm246_vm0, %v852_v3, %v853_v10  ;;  %v859_v46 = vsel %vm246_vm0, %v853_v10, %v854_v7 }
 0x119   : > { %v858_v42 = vsel %vm2868_vm15, %v2522_v33, %v856_v11  ;;  %v860_v50 = vsel %vm2868_vm15, %v847_v38, %v859_v46  ;;  %v895_v33 = vrot.slane %v2535_v51, 4  ;;  %vm1335_vm15 = vcmask 277504  }
 0x11a   : > { %868 = vst [vmem:[#allocation2 + $0xc4] sm:$0xcc] %v858_v42 }
 0x11b   : > { %869 = vst [vmem:[#allocation2 + $0xcc] sm:$0xcc] %v860_v50  ;;  %937 = vrot.lane.b32.xlu0 %v2352_v34, %s2193_s11  ;;  %v1026_v50 = vrot.slane %v2579_v43, 4 }
 0x11c   : > { %980 = vrot.lane.b32.xlu1 %v2378_v0, %s2194_s12 }
 0x11d   : > { %893 = vrot.lane.b32.xlu2 %v2334_v15, %s2192_s10  ;;  %v890_v18 = vpop.permute.xlu0 %889  ;;  %v2599_v19 = vpop.permute.xlu2 %1065 }
 0x11e   : > { %v896_v24 = vrot.slane %v890_v18, 4  ;;  %v977_v27 = vpop.permute.xlu1 %976 }
 0x11f   : > { %v983_v34 = vrot.slane %v977_v27, 4 }
 0x120   : > { %v899_v29 = vsel %vm246_vm0, %v895_v33, %v896_v24  ;;  %v902_v0 = vsel %vm246_vm0, %v896_v24, %v897_v2 }
 0x121   : > { %v901_v15 = vsel %vm900_vm1, %v2535_v51, %v899_v29  ;;  %v903_v30 = vsel %vm900_vm1, %v890_v18, %v902_v0  ;;  %v989_v37 = vsel %vm246_vm0, %v983_v34, %v984_v63 }
 0x122   : > { %911 = vst [vmem:[#allocation2 + $0xe0] sm:$0x33] %v901_v15  ;;  %v990_v41 = vsel %vm987_vm2, %v977_v27, %v989_v37 }
 0x123   : > { %912 = vst [vmem:[#allocation2 + $0xe8] sm:$0x33] %v903_v30  ;;  %719 = vrot.lane.b32.xlu0 %v2297_v52, %s2188_s6 }
 0x124   : > { %999 = vst [vmem:[#allocation2 + $0x104] sm:$0x33] %v990_v41  ;;  %763 = vrot.lane.b32.xlu1 %v2304_v56, %s2189_s7 }
 0x125   : > { %1024 = vrot.lane.b32.xlu2 %v2395_v20, %s2195_s13  ;;  %v2620_v51 = vpop.permute.xlu0 %935  ;;  %v1062_v47 = vpop.permute.xlu2 %1061 }
 0x126   : > { %v941_v59 = vrot.slane %v2620_v51, 4  ;;  %v975_v14 = vpop.permute.xlu1 %974 }
 0x127   : > { %v982_v62 = vrot.slane %v975_v14, 4 }
 0x128   : > { %v946_v52 = vsel %vm246_vm0, %v940_v54, %v941_v59 }
 0x129   : > { %v986_v38 = vsel %vm246_vm0, %v982_v62, %v983_v34  ;;  %v947_v56 = vsel %vm944_vm3, %v2552_v58, %v946_v52 }
 0x12a   : > { %v988_v20 = vsel %vm987_vm2, %v975_v14, %v986_v38  ;;  %956 = vst [vmem:[#allocation2 + $0xe8] sm:$0xcc] %v947_v56 }
 0x12b   : > { %998 = vst [vmem:[#allocation2 + $0xfc] sm:$0x33] %v988_v20  ;;  %850 = vrot.lane.b32.xlu0 %v2321_v6, %s2191_s9 }
 0x12c   : > { %545 = vrot.lane.b32.xlu1 %v2269_v36, %s2184_s28  ;;  %v1071_v36 = vrot.slane %v2599_v19, 4 }
 0x12d   : > { %806 = vrot.lane.b32.xlu2 %v2311_v61, %s2190_s8  ;;  %v932_v3 = vpop.permute.xlu0 %931  ;;  %v1069_v61 = vrot.slane %v1062_v47, 4 }
 0x12e   : > { %v939_v10 = vrot.slane %v932_v3, 4  ;;  %v2637_v11 = vpop.permute.xlu1 %1022 }
 0x12f   : > { %v2639_v46 = vpop.permute.xlu2 %1150  ;;  %v1028_v18 = vrot.slane %v2637_v11, 4 }
 0x130   : > { %v943_v58 = vsel %vm246_vm0, %v939_v10, %v940_v54 }
 0x131   : > { %v945_v42 = vsel %vm944_vm3, %v932_v3, %v943_v58 }
 0x132   : > { %955 = vst [vmem:[#allocation2 + $0xe0] sm:$0xcc] %v945_v42 }
 0x133   : > { %632 = vrot.lane.b32.xlu0 %v2281_v44, %s2185_s29  ;;  %s2131_s29 = smul.u32 28, %s2879_s16 }
 0x134   : > { %676 = vrot.lane.b32.xlu1 %v2288_v48, %s2187_s5 }
 0x135   : > { %589 = vrot.lane.b32.xlu2 %v2275_v40, %s2186_s30  ;;  %v1021_v6 = vpop.permute.xlu0 %1020  ;;  %s2853_s6 = scalar_lea.vmem %s2866_s4, %s2131_s29 }
 0x136   : > { %v1027_v33 = vrot.slane %v1021_v6, 4  ;;  %v1064_v24 = vpop.permute.xlu1 %1063 }
 0x137   : > { %v1070_v27 = vrot.slane %v1064_v24, 4  ;;  %v2652_v44 = vpop.permute.xlu2 %1154 }
 0x138   : > { %v1030_v48 = vsel %vm246_vm0, %v1026_v50, %v1027_v33  ;;  %v1033_v34 = vsel %vm246_vm0, %v1027_v33, %v1028_v18  ;;  %v1159_v40 = vrot.slane %v2652_v44, 4 }
 0x139   : > { %v1032_v29 = vsel %vm1031_vm4, %v2579_v43, %v1030_v48  ;;  %v1034_v0 = vsel %vm1031_vm4, %v1021_v6, %v1033_v34  ;;  %v1073_v15 = vsel %vm246_vm0, %v1069_v61, %v1070_v27  ;;  %v1076_v30 = vsel %vm246_vm0, %v1070_v27, %v1071_v36 }
 0x13a   : > { %1042 = vst [vmem:[#allocation2 + $0xfc] sm:$0xcc] %v1032_v29  ;;  %v1075_v37 = vsel %vm1074_vm5, %v1062_v47, %v1073_v15  ;;  %v1077_v41 = vsel %vm1074_vm5, %v1064_v24, %v1076_v30  ;;  %v1167_v54 = vsel %vm1161_vm7, %v2652_v44, %v1159_v40  ;;  %v1157_v48 = vrot.slane %v2639_v46, 4 }
 0x13b   : > { %1043 = vst [vmem:[#allocation2 + $0x104] sm:$0xcc] %v1034_v0 }
 0x13c   : > { %1085 = vst [vmem:[#allocation2 + $0x118] sm:$0x33] %v1075_v37 }
 0x13d   : > { %1086 = vst [vmem:[#allocation2 + $0x120] sm:$0x33] %v1077_v41  ;;  %v1068_v14 = vpop.permute.xlu0 %1067 }
 0x13e   : > { %1175 = vst [vmem:[#allocation2 + $0x14c] sm:$0x3] %v1167_v54  ;;  %v1072_v43 = vrot.slane %v1068_v14, 4  ;;  %v1110_v62 = vpop.permute.xlu1 %1109 }
 0x13f   : > { %v2668_v52 = vpop.permute.xlu2 %1196  ;;  %v1115_v3 = vrot.slane %v1110_v62, 4 }
 0x140   : > { %v1078_v38 = vsel %vm246_vm0, %v1071_v36, %v1072_v43  ;;  %v1080_v56 = vsel %vm1074_vm5, %v1068_v14, %v1072_v43  ;;  %v1202_v41 = vrot.slane %v2668_v52, 4 }
 0x141   : > { %v1079_v47 = vsel %vm1074_vm5, %v2599_v19, %v1078_v38  ;;  %1088 = vst [vmem:[#allocation2 + $0x130] sm:$0x3] %v1080_v56  ;;  %vm1205_vm5 = vcmask 359424  }
 0x142   : > { %1087 = vst [vmem:[#allocation2 + $0x128] sm:$0x33] %v1079_v47 }
 0x145   : > { %v1108_v20 = vpop.permute.xlu0 %1107 }
 0x146   : > { %v1112_v10 = vpop.permute.xlu1 %1111  ;;  %v1114_v58 = vrot.slane %v1108_v20, 4 }
 0x147   : > { %v1116_v42 = vrot.slane %v1112_v10, 4  ;;  %v1193_v61 = vpop.permute.xlu2 %1192 }
 0x148   : > { %v1120_v6 = vsel %vm246_vm0, %v1114_v58, %v1115_v3  ;;  %v1200_v54 = vrot.slane %v1193_v61, 4 }
 0x149   : > { %v1122_v50 = vsel %vm246_vm0, %v1115_v3, %v1116_v42  ;;  %v1124_v36 = vsel %vm1118_vm6, %v1112_v10, %v1116_v42  ;;  %v1121_v33 = vsel %vm1118_vm6, %v1108_v20, %v1120_v6 }
 0x14a   : > { %v1123_v24 = vsel %vm1118_vm6, %v1110_v62, %v1122_v50  ;;  %1132 = vst [vmem:[#allocation2 + $0x130] sm:$0xc] %v1124_v36 }
 0x14b   : > { %1131 = vst [vmem:[#allocation2 + $0x128] sm:$0xcc] %v1123_v24 }
 0x14c   : > { %1130 = vst [vmem:[#allocation2 + $0x120] sm:$0xcc] %v1121_v33 }
 0x14d   : > { %v1106_v19 = vpop.permute.xlu0 %1105 }
 0x14e   : > { %v1113_v27 = vrot.slane %v1106_v19, 4  ;;  %v1149_v44 = vpop.permute.xlu1 %1148 }
 0x14f   : > { %v1156_v34 = vrot.slane %v1149_v44, 4  ;;  %v1240_v29 = vpop.permute.xlu2 %1239 }
 0x150   : > { %v1117_v0 = vsel %vm246_vm0, %v1113_v27, %v1114_v58  ;;  %v1245_v47 = vrot.slane %v1240_v29, 4 }
 0x151   : > { %v1119_v15 = vsel %vm1118_vm6, %v1106_v19, %v1117_v0  ;;  %v1160_v30 = vsel %vm246_vm0, %v1156_v34, %v1157_v48  ;;  %vm1248_vm6 = vcmask 293888  }
 0x152   : > { %1129 = vst [vmem:[#allocation2 + $0x118] sm:$0xcc] %v1119_v15  ;;  %v1162_v37 = vsel %vm1161_vm7, %v1149_v44, %v1160_v30 }
 0x153   : > { %1172 = vst [vmem:[#allocation2 + $0x134] sm:$0x33] %v1162_v37 }
 0x155   : > { %v1153_v14 = vpop.permute.xlu0 %1152 }
 0x156   : > { %v1158_v43 = vrot.slane %v1153_v14, 4  ;;  %v1195_v62 = vpop.permute.xlu1 %1194 }
 0x157   : > { %v1201_v38 = vrot.slane %v1195_v62, 4  ;;  %v1242_v56 = vpop.permute.xlu2 %1241 }
 0x158   : > { %v1163_v20 = vsel %vm246_vm0, %v1157_v48, %v1158_v43  ;;  %v1165_v3 = vsel %vm246_vm0, %v1158_v43, %v1159_v40  ;;  %v1246_v10 = vrot.slane %v1242_v56, 4 }
 0x159   : > { %v1164_v58 = vsel %vm1161_vm7, %v2639_v46, %v1163_v20  ;;  %v1166_v42 = vsel %vm1161_vm7, %v1153_v14, %v1165_v3  ;;  %v1204_v6 = vsel %vm246_vm0, %v1200_v54, %v1201_v38  ;;  %v1207_v50 = vsel %vm246_vm0, %v1201_v38, %v1202_v41 }
 0x15a   : > { %1173 = vst [vmem:[#allocation2 + $0x13c] sm:$0x33] %v1164_v58  ;;  %v1206_v36 = vsel %vm1205_vm5, %v1193_v61, %v1204_v6  ;;  %v1208_v33 = vsel %vm1205_vm5, %v1195_v62, %v1207_v50  ;;  %v1252_v40 = vsel %vm246_vm0, %v1245_v47, %v1246_v10  ;;  %v1254_v46 = vsel %vm1248_vm6, %v1242_v56, %v1246_v10 }
 0x15b   : > { %1174 = vst [vmem:[#allocation2 + $0x144] sm:$0x33] %v1166_v42  ;;  %v1253_v24 = vsel %vm1248_vm6, %v1240_v29, %v1252_v40  ;;  %vm1292_vm7 = vcmask 285696  }
 0x15c   : > { %1216 = vst [vmem:[#allocation2 + $0x134] sm:$0xcc] %v1206_v36 }
 0x15d   : > { %1217 = vst [vmem:[#allocation2 + $0x13c] sm:$0xcc] %v1208_v33  ;;  %v1236_v19 = vpop.permute.xlu0 %1235 }
 0x15e   : > { %1261 = vst [vmem:[#allocation2 + $0x160] sm:$0x33] %v1253_v24  ;;  %v1238_v27 = vpop.permute.xlu1 %1237  ;;  %v1243_v44 = vrot.slane %v1236_v19, 4 }
 0x15f   : > { %1262 = vst [vmem:[#allocation2 + $0x168] sm:$0x3] %v1254_v46  ;;  %v1244_v48 = vrot.slane %v1238_v27, 4  ;;  %v1325_v34 = vpop.permute.xlu2 %1324 }
 0x160   : > { %v1331_v37 = vrot.slane %v1325_v34, 4 }
 0x161   : > { %v1250_v61 = vsel %vm246_vm0, %v1244_v48, %v1245_v47  ;;  %v1247_v0 = vsel %vm246_vm0, %v1243_v44, %v1244_v48 }
 0x162   : > { %v1251_v15 = vsel %vm1248_vm6, %v1238_v27, %v1250_v61  ;;  %v1249_v30 = vsel %vm1248_vm6, %v1236_v19, %v1247_v0  ;;  %vm1662_vm6 = vcmask 1045504  }
 0x163   : > { %1260 = vst [vmem:[#allocation2 + $0x158] sm:$0x33] %v1251_v15 }
 0x164   : > { %1259 = vst [vmem:[#allocation2 + $0x150] sm:$0x33] %v1249_v30 }
 0x165   : > { %v1282_v29 = vpop.permute.xlu0 %1281 }
 0x166   : > { %v1284_v54 = vpop.permute.xlu1 %1283  ;;  %v1288_v14 = vrot.slane %v1282_v29, 4 }
 0x167   : > { %v1289_v43 = vrot.slane %v1284_v54, 4  ;;  %v1323_v62 = vpop.permute.xlu2 %1322 }
 0x168   : > { %v1330_v38 = vrot.slane %v1323_v62, 4 }
 0x169   : > { %v1294_v56 = vsel %vm246_vm0, %v1288_v14, %v1289_v43 }
 0x16a   : > { %v1295_v47 = vsel %vm1292_vm7, %v1282_v29, %v1294_v56  ;;  %v1334_v20 = vsel %vm246_vm0, %v1330_v38, %v1331_v37 }
 0x16b   : > { %1304 = vst [vmem:[#allocation2 + $0x158] sm:$0xcc] %v1295_v47  ;;  %v1336_v3 = vsel %vm1335_vm15, %v1323_v62, %v1334_v20 }
 0x16c   : > { %1346 = vst [vmem:[#allocation2 + $0x16c] sm:$0x33] %v1336_v3 }
 0x16d   : > { %v1286_v10 = vpop.permute.xlu0 %1285 }
 0x16e   : > { %v1290_v58 = vrot.slane %v1286_v10, 4  ;;  %v1280_v42 = vpop.permute.xlu1 %1279 }
 0x16f   : > { %v1287_v6 = vrot.slane %v1280_v42, 4  ;;  %v584_v50 = vpop.permute.xlu2 %583 }
 0x170   : > { %v1296_v36 = vsel %vm246_vm0, %v1289_v43, %v1290_v58  ;;  %v1298_v33 = vsel %vm1292_vm7, %v1286_v10, %v1290_v58  ;;  %v591_v40 = vrot.slane %v584_v50, 4  ;;  %v2119_v58 = vld [vmem:[#allocation2 + $0x130] sm:$0xf0] }
 0x171   : > { %v1297_v24 = vsel %vm1292_vm7, %v1284_v54, %v1296_v36  ;;  %1306 = vst [vmem:[#allocation2 + $0x168] sm:$0xc] %v1298_v33  ;;  %v1291_v46 = vsel %vm246_vm0, %v1287_v6, %v1288_v14  ;;  %v2020_v36 = vld [vmem:[#allocation2 + $0x134] sm:$0xf0] }
 0x172   : > { %1305 = vst [vmem:[#allocation2 + $0x160] sm:$0xcc] %v1297_v24  ;;  %v1293_v19 = vsel %vm1292_vm7, %v1280_v42, %v1291_v46  ;;  %v595_v27 = vsel %vm246_vm0, %v591_v40, %v592_v1  ;;  %v2018_v40 = vld [vmem:[#allocation2 + $0x118] sm:$0xf] }
 0x173   : > { %1303 = vst [vmem:[#allocation2 + $0x150] sm:$0xcc] %v1293_v19  ;;  %v597_v44 = vsel %vm596_vm10, %v584_v50, %v595_v27  ;;  %v2126_v14 = vld [vmem:[#allocation2 + $0x168] sm:$0x30]  ;;  %v2048_v43 = vld [vmem:[#allocation2 + $0x16c] sm:$0x30]  ;;  %v2019_v46 = vor.u32 %v2119_v58, %v2018_v40 }
 0x174   : > { %607 = vst [vmem:[#allocation2 + $0x70] sm:$0xcc] %v597_v44  ;;  %v2116_v19 = vld [vmem:[#allocation2 + $0x11c] sm:$0xf] }
 0x175   : > { %v1327_v48 = vpop.permute.xlu0 %1326 }
 0x176   : > { %v1332_v61 = vrot.slane %v1327_v48, 4  ;;  %v1329_v0 = vpop.permute.xlu1 %1328 }
 0x177   : > { %v1333_v15 = vrot.slane %v1329_v0, 4  ;;  %v894_v30 = vpop.permute.xlu2 %893 }
 0x178   : > { %v1337_v29 = vsel %vm246_vm0, %v1331_v37, %v1332_v61  ;;  %v898_v54 = vrot.slane %v894_v30, 4 }
 0x179   : > { %v1338_v62 = vsel %vm1335_vm15, %v1325_v34, %v1337_v29  ;;  %v1339_v21 = vsel %vm246_vm0, %v1332_v61, %v1333_v15  ;;  %v1341_v1 = vsel %vm1335_vm15, %v1329_v0, %v1333_v15  ;;  %v2023_v61 = vor.u32 %v2116_v19, %v2020_v36  ;;  %v2112_v0 = vld [vmem:[#allocation2 + $0xf8] sm:$0xf0]  ;;  %v1992_v15 = vld [vmem:[#allocation2 + $0xfc] sm:$0xf0] }
 0x17a   : > { %1347 = vst [vmem:[#allocation2 + $0x174] sm:$0x33] %v1338_v62  ;;  %v1340_v38 = vsel %vm1335_vm15, %v1327_v48, %v1339_v21  ;;  %v904_v56 = vsel %vm246_vm0, %v897_v2, %v898_v54  ;;  %v2046_v47 = vld [vmem:[#allocation2 + $0x150] sm:$0xf]  ;;  %v2123_v20 = vld [vmem:[#allocation2 + $0x154] sm:$0xf]  ;;  %v906_v34 = vsel %vm900_vm1, %v894_v30, %v898_v54 }
 0x17b   : > { %1348 = vst [vmem:[#allocation2 + $0x17c] sm:$0x33] %v1340_v38  ;;  %v905_v37 = vsel %vm900_vm1, %v2583_v49, %v904_v56  ;;  %v2047_v3 = vor.u32 %v2126_v14, %v2046_v47  ;;  %v2051_v10 = vor.u32 %v2123_v20, %v2048_v43  ;;  %v2054_v21 = vld [vmem:[#allocation2 + $0x158] sm:$0xf]  ;;  %v2026_v19 = vld [vmem:[#allocation2 + $0x120] sm:$0xf] }
 0x17c   : > { %1349 = vst [vmem:[#allocation2 + $0x184] sm:$0x3] %v1341_v1  ;;  %v2109_v1 = vld [vmem:[#allocation2 + $0xe4] sm:$0xf] }
 0x17d   : > { %913 = vst [vmem:[#allocation2 + $0xf0] sm:$0x33] %v905_v37  ;;  %v1199_v42 = vpop.permute.xlu0 %1198  ;;  %v1664_v6 = vsel %vm1662_vm6, %v2047_v3, 0  ;;  %v1667_v50 = vsel %vm1662_vm6, %v2051_v10, 0  ;;  %v1995_v20 = vor.u32 %v2109_v1, %v1992_v15  ;;  %v2105_v37 = vld [vmem:[#allocation2 + $0xc0] sm:$0xf0] }
 0x17e   : > { %914 = vst [vmem:[#allocation2 + $0xf8] sm:$0x3] %v906_v34  ;;  %v1203_v2 = vrot.slane %v1199_v42, 4  ;;  %v540_v33 = vpop.permute.xlu1 %539  ;;  %1685 = vmatpush.bf16.msra.mxu0 %v1664_v6  ;;  %1698 = vmatpush.bf16.msra.mxu1 %v1667_v50  ;;  %v1964_v10 = vld [vmem:[#allocation2 + $0xc4] sm:$0xf0] }
 0x17f   : > { %v547_v49 = vrot.slane %v540_v33, 4  ;;  %v1025_v24 = vpop.permute.xlu2 %1024  ;;  %v2028_v6 = vld [vmem:[#allocation2 + $0x13c] sm:$0xf0]  ;;  %v1970_v1 = vld [vmem:[#allocation2 + $0xb0] sm:$0xf] }
 0x180   : > { %v1209_v27 = vsel %vm246_vm0, %v1202_v41, %v1203_v2  ;;  %v1211_v44 = vsel %vm1205_vm5, %v1199_v42, %v1203_v2  ;;  %v1029_v48 = vrot.slane %v1025_v24, 4  ;;  %v1962_v2 = vld [vmem:[#allocation2 + $0xa8] sm:$0xf] }
 0x181   : > { %v1210_v30 = vsel %vm1205_vm5, %v2668_v52, %v1209_v27  ;;  %1219 = vst [vmem:[#allocation2 + $0x14c] sm:$0xc] %v1211_v44  ;;  %v551_v29 = vsel %vm246_vm0, %v547_v49, %v548_v17  ;;  %v2127_v54 = vld [vmem:[#allocation2 + $0x170] sm:$0x30]  ;;  %v2056_v14 = vld [vmem:[#allocation2 + $0x174] sm:$0x30] }
 0x182   : > { %1218 = vst [vmem:[#allocation2 + $0x144] sm:$0xcc] %v1210_v30  ;;  %v553_v43 = vsel %vm552_vm9, %v540_v33, %v551_v29  ;;  %v1035_v41 = vsel %vm246_vm0, %v1028_v18, %v1029_v48  ;;  %v1037_v62 = vsel %vm1031_vm4, %v1025_v24, %v1029_v48  ;;  %1686 = vmatpush.bf16.msra.mxu0 %v2019_v46  ;;  %v2124_v52 = vld [vmem:[#allocation2 + $0x15c] sm:$0xf]  ;;  %v1990_v17 = vld [vmem:[#allocation2 + $0xe0] sm:$0xf] }
 0x183   : > { %1699 = vmatpush.bf16.msra.mxu1 %v2023_v61  ;;  %563 = vst [vmem:[#allocation2 + $0x70] sm:$0x33] %v553_v43  ;;  %v1036_v12 = vsel %vm1031_vm4, %v2637_v11, %v1035_v41  ;;  %v2055_v38 = vor.u32 %v2127_v54, %v2054_v21  ;;  %v2059_v56 = vor.u32 %v2124_v52, %v2056_v14  ;;  %v2120_v11 = vld [vmem:[#allocation2 + $0x138] sm:$0xf0]  ;;  %v2102_v33 = vld [vmem:[#allocation2 + $0xac] sm:$0xf] }
 0x184   : > { %1044 = vst [vmem:[#allocation2 + $0x10c] sm:$0xcc] %v1036_v12  ;;  %v1991_v47 = vor.u32 %v2112_v0, %v1990_v17  ;;  %v1963_v24 = vor.u32 %v2105_v37, %v1962_v2  ;;  %v1967_v46 = vor.u32 %v2102_v33, %v1964_v10  ;;  %v2117_v27 = vld [vmem:[#allocation2 + $0x124] sm:$0xf]  ;;  %v2027_v61 = vor.u32 %v2120_v11, %v2026_v19  ;;  %v2000_v29 = vld [vmem:[#allocation2 + $0x104] sm:$0xf0] }
 0x185   : > { %1045 = vst [vmem:[#allocation2 + $0x114] sm:$0xc] %v1037_v62  ;;  %v627_v18 = vpop.permute.xlu0 %626  ;;  %v1670_v34 = vsel %vm1662_vm6, %v2055_v38, 0  ;;  %v1673_v3 = vsel %vm1662_vm6, %v2059_v56, 0  ;;  %v2031_v0 = vor.u32 %v2117_v27, %v2028_v6  ;;  %v2113_v30 = vld [vmem:[#allocation2 + $0x100] sm:$0xf0] }
 0x186   : > { %v634_v58 = vrot.slane %v627_v18, 4  ;;  %v671_v42 = vpop.permute.xlu1 %670  ;;  %1687 = vmatpush.bf16.msra.mxu0 %v1991_v47  ;;  %1711 = vmatpush.bf16.msra.mxu2 %v1670_v34  ;;  %v2110_v54 = vld [vmem:[#allocation2 + $0xec] sm:$0xf]  ;;  %v1972_v52 = vld [vmem:[#allocation2 + $0xcc] sm:$0xf0] }
 0x187   : > { %1700 = vmatpush.bf16.msra.mxu1 %v1995_v20  ;;  %v678_v50 = vrot.slane %v671_v42, 4  ;;  %1724 = vmatpush.bf16.msra.mxu3 %v1673_v3  ;;  %v807_v36 = vpop.permute.xlu2 %806  ;;  %v2003_v41 = vor.u32 %v2110_v54, %v2000_v29  ;;  %v2103_v20 = vld [vmem:[#allocation2 + $0xb4] sm:$0xf]  ;;  %v2771_v11 = vld [vmem:[#allocation2 + $0x58] sm:$0xf0] }
 0x188   : > { %v638_v40 = vsel %vm246_vm0, %v634_v58, %v635_v9  ;;  %v811_v49 = vrot.slane %v807_v36, 4  ;;  %v2099_v37 = vld [vmem:[#allocation2 + $0x90] sm:$0xf0]  ;;  %v1975_v58 = vor.u32 %v2103_v20, %v1972_v52  ;;  %v1942_v19 = vld [vmem:[#allocation2 + $0x78] sm:$0xf] }
 0x189   : > { %v640_v44 = vsel %vm639_vm8, %v627_v18, %v638_v40  ;;  %v682_v48 = vsel %vm246_vm0, %v678_v50, %v679_v35  ;;  %v1998_v35 = vld [vmem:[#allocation2 + $0xe8] sm:$0xf]  ;;  %v1944_v18 = vld [vmem:[#allocation2 + $0x94] sm:$0xf0]  ;;  %v2096_v27 = vld [vmem:[#allocation2 + $0x7c] sm:$0xf] }
 0x18a   : > { %650 = vst [vmem:[#allocation2 + $0x8c] sm:$0x33] %v640_v44  ;;  %v684_v15 = vsel %vm683_vm11, %v671_v42, %v682_v48  ;;  %v817_v8 = vsel %vm246_vm0, %v810_v45, %v811_v49  ;;  %v819_v9 = vsel %vm813_vm13, %v807_v36, %v811_v49  ;;  %1688 = vmatpush.bf16.msra.mxu0 %v1963_v24  ;;  %v2106_v45 = vld [vmem:[#allocation2 + $0xc8] sm:$0xf0]  ;;  %v1934_v42 = vld [vmem:[#allocation2 + $0x70] sm:$0xf] }
 0x18b   : > { %1701 = vmatpush.bf16.msra.mxu1 %v1967_v46  ;;  %694 = vst [vmem:[#allocation2 + $0x8c] sm:$0xcc] %v684_v15  ;;  %v818_v31 = vsel %vm813_vm13, %v2504_v26, %v817_v8  ;;  %1712 = vmatpush.bf16.msra.mxu2 %v2027_v61  ;;  %v1999_v43 = vor.u32 %v2113_v30, %v1998_v35  ;;  %v2091_v24 = vld [vmem:[#allocation2 + $0x50] sm:$0xf0]  ;;  %v1908_v46 = vld [vmem:[#allocation2 + $0x54] sm:$0xf0] }
 0x18c   : > { %1725 = vmatpush.bf16.msra.mxu3 %v2031_v0  ;;  %826 = vst [vmem:[#allocation2 + $0xd4] sm:$0x33] %v818_v31  ;;  %v1971_v47 = vor.u32 %v2106_v45, %v1970_v1  ;;  %v2088_v44 = vld [vmem:[#allocation2 + $0x3c] sm:$0xf]  ;;  %v1943_v61 = vor.u32 %v2099_v37, %v1942_v19  ;;  %v1947_v0 = vor.u32 %v2096_v27, %v1944_v18  ;;  %v2089_v29 = vld [vmem:[#allocation2 + $0x44] sm:$0xf] }
 0x18d   : > { %827 = vst [vmem:[#allocation2 + $0xdc] sm:$0x3] %v819_v9  ;;  %v938_v14 = vpop.permute.xlu0 %937  ;;  %v2128_v15 = vld [vmem:[#allocation2 + $0x178] sm:$0x30]  ;;  %v1911_v54 = vor.u32 %v2088_v44, %v1908_v46  ;;  %v2085_v20 = vld [vmem:[#allocation2 + $0x20] sm:$0xf0] }
 0x18e   : > { %v942_v62 = vrot.slane %v938_v14, 4  ;;  %v981_v21 = vpop.permute.xlu1 %980  ;;  %v2084_v52 = vld [vmem:[#allocation2 + $0x18] sm:$0xf0]  ;;  %v1888_v18 = vld [vmem:[#allocation2 + $0x24] sm:$0xf0] }
 0x18f   : > { %v985_v12 = vrot.slane %v981_v21, 4  ;;  %1713 = vmatpush.bf16.msra.mxu2 %v1999_v43  ;;  %v590_v17 = vpop.permute.xlu2 %589  ;;  %v2062_v43 = vld [vmem:[#allocation2 + $0x160] sm:$0xf]  ;;  %v2042_v46 = vld [vmem:[#allocation2 + $0x130] sm:$0xf] }
 0x190   : > { %1726 = vmatpush.bf16.msra.mxu3 %v2003_v41  ;;  %v948_v26 = vsel %vm246_vm0, %v941_v59, %v942_v62  ;;  %v950_v38 = vsel %vm944_vm3, %v938_v14, %v942_v62  ;;  %v594_v56 = vrot.slane %v590_v17, 4  ;;  %v2095_v59 = vld [vmem:[#allocation2 + $0x74] sm:$0xf]  ;;  %v2125_v41 = vld [vmem:[#allocation2 + $0x164] sm:$0xf] }
 0x191   : > { %v949_v34 = vsel %vm944_vm3, %v2620_v51, %v948_v26  ;;  %958 = vst [vmem:[#allocation2 + $0xf8] sm:$0xc] %v950_v38  ;;  %v991_v3 = vsel %vm246_vm0, %v984_v63, %v985_v12  ;;  %v993_v10 = vsel %vm987_vm2, %v981_v21, %v985_v12  ;;  %v1916_v63 = vld [vmem:[#allocation2 + $0x5c] sm:$0xf0]  ;;  %v2129_v26 = vld [vmem:[#allocation2 + $0x180] sm:$0x30] }
 0x192   : > { %957 = vst [vmem:[#allocation2 + $0xf0] sm:$0xcc] %v949_v34  ;;  %v992_v6 = vsel %vm987_vm2, %v2567_v57, %v991_v3  ;;  %v600_v51 = vsel %vm246_vm0, %v593_v28, %v594_v56  ;;  %v602_v50 = vsel %vm596_vm10, %v590_v17, %v594_v56  ;;  %v2098_v36 = vld [vmem:[#allocation2 + $0x88] sm:$0xf0]  ;;  %v1936_v2 = vld [vmem:[#allocation2 + $0x8c] sm:$0xf0]  ;;  %v1919_v14 = vor.u32 %v2089_v29, %v1916_v63 }
 0x193   : > { %1000 = vst [vmem:[#allocation2 + $0x10c] sm:$0x33] %v992_v6  ;;  %v601_v33 = vsel %vm596_vm10, %v2502_v25, %v600_v51  ;;  %1714 = vmatpush.bf16.msra.mxu2 %v1971_v47  ;;  %v1935_v40 = vor.u32 %v2098_v36, %v1934_v42  ;;  %v1939_v49 = vor.u32 %v2095_v59, %v1936_v2  ;;  %v1914_v57 = vld [vmem:[#allocation2 + $0x40] sm:$0xf]  ;;  %v1906_v28 = vld [vmem:[#allocation2 + $0x38] sm:$0xf] }
 0x194   : > { %1727 = vmatpush.bf16.msra.mxu3 %v1975_v58  ;;  %1001 = vst [vmem:[#allocation2 + $0x114] sm:$0x3] %v993_v10  ;;  %v2064_v25 = vld [vmem:[#allocation2 + $0x17c] sm:$0x30]  ;;  %v1915_v30 = vor.u32 %v2771_v11, %v1914_v57  ;;  %v1907_v35 = vor.u32 %v2091_v24, %v1906_v28  ;;  %v2063_v17 = vor.u32 %v2128_v15, %v2062_v43  ;;  %v2070_v34 = vld [vmem:[#allocation2 + $0x168] sm:$0xf] }
 0x195   : > { %609 = vst [vmem:[#allocation2 + $0x80] sm:$0xcc] %v601_v33  ;;  %1689 = vmatpush.bf16.msra.mxu0 %v1935_v40  ;;  %1702 = vmatpush.bf16.msra.mxu1 %v1939_v49  ;;  %v720_v48 = vpop.permute.xlu0 %719  ;;  %v1878_v21 = vld [vmem:[#allocation2] sm:$0xf]  ;;  %v2067_v1 = vor.u32 %v2125_v41, %v2064_v25  ;;  %v1886_v10 = vld [vmem:[#allocation2 + $0x8] sm:$0xf]  ;;  %v2071_v58 = vor.u32 %v2129_v26, %v2070_v34 }
 0x196   : > { %610 = vst [vmem:[#allocation2 + $0x88] sm:$0xc] %v602_v50  ;;  %v724_v8 = vrot.slane %v720_v48, 4  ;;  %v764_v9 = vpop.permute.xlu1 %763  ;;  %v1880_v12 = vld [vmem:[#allocation2 + $0x1c] sm:$0xf0]  ;;  %v1887_v11 = vor.u32 %v2085_v20, %v1886_v10  ;;  %v1676_v51 = vsel %vm1662_vm6, %v2063_v17, 0 }
 0x197   : > { %v768_v31 = vrot.slane %v764_v9, 4  ;;  %1715 = vmatpush.bf16.msra.mxu2 %v1943_v61  ;;  %v2121_v42 = vld [vmem:[#allocation2 + $0x140] sm:$0xf0]  ;;  %v2036_v50 = vld [vmem:[#allocation2 + $0x144] sm:$0xf0]  ;;  %v1682_v49 = vsel %vm1662_vm6, %v2071_v58, 0 }
 0x198   : > { %1728 = vmatpush.bf16.msra.mxu3 %v1947_v0  ;;  %v730_v45 = vsel %vm246_vm0, %v723_v55, %v724_v8  ;;  %v732_v62 = vsel %vm726_vm12, %v720_v48, %v724_v8  ;;  %v2081_v55 = vld [vmem:[#allocation2 + $0x4] sm:$0xf]  ;;  %v2034_v63 = vld [vmem:[#allocation2 + $0x128] sm:$0xf]  ;;  %v2118_v33 = vld [vmem:[#allocation2 + $0x12c] sm:$0xf] }
 0x199   : > { %v731_v38 = vsel %vm726_vm12, %v2517_v39, %v730_v45  ;;  %740 = vst [vmem:[#allocation2 + $0xc0] sm:$0x3] %v732_v62  ;;  %v774_v56 = vsel %vm246_vm0, %v767_v23, %v768_v31  ;;  %v776_v47 = vsel %vm770_vm14, %v764_v9, %v768_v31  ;;  %1690 = vmatpush.bf16.msra.mxu0 %v1907_v35  ;;  %v2082_v23 = vld [vmem:[#allocation2 + $0xc] sm:$0xf]  ;;  %v2800_v19 = vld [vmem:[%s2863_s1] sm:$0xf] }
 0x19a   : > { %1703 = vmatpush.bf16.msra.mxu1 %v1911_v54  ;;  %739 = vst [vmem:[#allocation2 + $0xb8] sm:$0x33] %v731_v38  ;;  %v775_v37 = vsel %vm770_vm14, %v2550_v5, %v774_v56  ;;  %v1879_v39 = vor.u32 %v2084_v52, %v1878_v21  ;;  %v1883_v3 = vor.u32 %v2081_v55, %v1880_v12  ;;  %v1679_v5 = vsel %vm1662_vm6, %v2067_v1, 0  ;;  %v2122_v57 = vld [vmem:[#allocation2 + $0x148] sm:$0xf0] }
 0x19b   : > { %783 = vst [vmem:[#allocation2 + $0xb8] sm:$0xcc] %v775_v37  ;;  %1716 = vmatpush.bf16.msra.mxu2 %v1915_v30  ;;  %v1891_v6 = vor.u32 %v2082_v23, %v1888_v18  ;;  %v2035_v24 = vor.u32 %v2121_v42, %v2034_v63  ;;  %vm2869_vm10 = vcmask 64512   ;;  %v2039_v44 = vor.u32 %v2118_v33, %v2036_v50  ;;  %v2006_v48 = vld [vmem:[#allocation2 + $0xf0] sm:$0xf] }
 0x19c   : > { %1729 = vmatpush.bf16.msra.mxu3 %v1919_v14  ;;  %784 = vst [vmem:[#allocation2 + $0xc0] sm:$0xc] %v776_v47  ;;  %v2114_v61 = vld [vmem:[#allocation2 + $0x108] sm:$0xf0]  ;;  %v2111_v0 = vld [vmem:[#allocation2 + $0xf4] sm:$0xf]  ;;  %vm2871_vm13 = vmmov %vm2869_vm10  ;;  %v2043_v30 = vor.u32 %v2122_v57, %v2042_v46 }
 0x19d   : > { %1691 = vmatpush.bf16.msra.mxu0 %v1879_v39  ;;  %v851_v59 = vpop.permute.xlu0 %850  ;;  %vm2870_vm12 = vcmask 883712   ;;  %v2008_v8 = vld [vmem:[#allocation2 + $0x10c] sm:$0xf0]  ;;  %v2115_v29 = vld [vmem:[#allocation2 + $0x110] sm:$0xf0]  ;;  %v2007_v31 = vor.u32 %v2114_v61, %v2006_v48  ;;  %v2203_v35 = vmov 0  }
 0x19e   : > { %1704 = vmatpush.bf16.msra.mxu1 %v1883_v3  ;;  %v855_v36 = vrot.slane %v851_v59, 4  ;;  %v546_v2 = vpop.permute.xlu1 %545  ;;  %vm2872_vm14 = vmmov %vm2870_vm12  ;;  %2167 = vset.pattern.permute.xlu2 %v2203_v35  ;;  %v2086_v63 = vld [vmem:[#allocation2 + $0x28] sm:$0xf0]  ;;  %v1896_v33 = vld [vmem:[#allocation2 + $0x2c] sm:$0xf0] }
 0x19f   : > { %v550_v40 = vrot.slane %v546_v2, 4  ;;  %1717 = vmatpush.bf16.msra.mxu2 %v1887_v11  ;;  %vm2873_vm15 = vmmov %vm2870_vm12  ;;  %2168 = vset.pattern.permute.xlu0 %v2203_v35  ;;  %v1924_v11 = vld [vmem:[#allocation2 + $0x64] sm:$0xf0]  ;;  %v1902_v46 = vld [vmem:[#allocation2 + $0x18] sm:$0xf] }
 0x1a0   : > { %1730 = vmatpush.bf16.msra.mxu3 %v1891_v6  ;;  %v861_v27 = vsel %vm246_vm0, %v854_v7, %v855_v36  ;;  %v863_v28 = vsel %vm2869_vm10, %v851_v59, %v855_v36  ;;  %2072 = vmatmul.msk.bf16.vlgmr.msra.gmra.mxu0 %vm2870_vm12, %v2800_v19  ;;  %vm2874_vm1 = vmmov %vm2870_vm12  ;;  %v2093_v59 = vld [vmem:[#allocation2 + $0x60] sm:$0xf0]  ;;  %v1922_v6 = vld [vmem:[#allocation2 + $0x48] sm:$0xf] }
 0x1a1   : > { %1737 = vmatpush.bf16.msrb.mxu0 %v1676_v51  ;;  %v862_v15 = vsel %vm2871_vm13, %v2569_v60, %v861_v27  ;;  %871 = vst [vmem:[#allocation2 + $0xdc] sm:$0xc] %v863_v28  ;;  %v556_v25 = vsel %vm246_vm0, %v549_v16, %v550_v40  ;;  %v558_v7 = vsel %vm552_vm9, %v546_v2, %v550_v40  ;;  %v1407_v60 = vld [vmem:[%s2864_s2] sm:$0xff]  ;;  %v2090_v51 = vld [vmem:[#allocation2 + $0x4c] sm:$0xf] }
 0x1a2   : > { %1750 = vmatpush.bf16.msrb.mxu1 %v1679_v5  ;;  %870 = vst [vmem:[#allocation2 + $0xd4] sm:$0xcc] %v862_v15  ;;  %v557_v9 = vsel %vm552_vm9, %v2456_v53, %v556_v25  ;;  %2074 = vmatmul.msk.bf16.vlgmr.msra.gmra.mxu2 %vm2873_vm15, %v2800_v19  ;;  %v2014_v16 = vld [vmem:[#allocation2 + $0xf8] sm:$0xf]  ;;  %v2011_v53 = vor.u32 %v2111_v0, %v2008_v8  ;;  %v2104_v1 = vld [vmem:[#allocation2 + $0xbc] sm:$0xf] }
 0x1a3   : > { %1763 = vmatpush.bf16.msrb.mxu2 %v1682_v49  ;;  %2073 = vmatmul.msk.bf16.vlgmr.msra.gmra.mxu1 %vm2872_vm14, %v2800_v19  ;;  %565 = vst [vmem:[#allocation2 + $0x80] sm:$0x33] %v557_v9  ;;  %v2015_v41 = vor.u32 %v2115_v29, %v2014_v16  ;;  %v1978_v62 = vld [vmem:[#allocation2 + $0xb8] sm:$0xf]  ;;  %v1986_v12 = vld [vmem:[#allocation2 + $0xc0] sm:$0xf]  ;;  %v1923_v50 = vor.u32 %v2093_v59, %v1922_v6 }
 0x1a4   : > { %2075 = vmatmul.msk.bf16.vlgmr.msra.gmra.mxu3 %vm2874_vm1, %v2800_v19  ;;  %566 = vst [vmem:[#allocation2 + $0x88] sm:$0x3] %v558_v7  ;;  %1410 = vperm.xlu2 %2167, %v1407_v60   ;;  %v1930_v5 = vld [vmem:[#allocation2 + $0x50] sm:$0xf]  ;;  %v1927_v36 = vor.u32 %v2090_v51, %v1924_v11  ;;  %v2087_v40 = vld [vmem:[#allocation2 + $0x30] sm:$0xf0] }
 0x1a5   : > { %1738 = vmatpush.bf16.msrb.mxu0 %v2035_v24  ;;  %v633_v54 = vpop.permute.xlu0 %632  ;;  %v1894_v49 = vld [vmem:[#allocation2 + $0x10] sm:$0xf]  ;;  %v2083_v24 = vld [vmem:[#allocation2 + $0x14] sm:$0xf]  ;;  %v1903_v28 = vor.u32 %v2087_v40, %v1902_v46 }
 0x1a6   : > { %1751 = vmatpush.bf16.msrb.mxu1 %v2039_v44  ;;  %v637_v14 = vrot.slane %v633_v54, 4  ;;  %v677_v43 = vpop.permute.xlu1 %676  ;;  %v1895_v57 = vor.u32 %v2086_v63, %v1894_v49  ;;  %v1899_v27 = vor.u32 %v2083_v24, %v1896_v33  ;;  %v1782_v44 = vld [vmem:[%s2865_s3] sm:$0xff] }
 0x1a7   : > { %1764 = vmatpush.bf16.msrb.mxu2 %v2043_v30  ;;  %v681_v45 = vrot.slane %v677_v43, 4 }
 0x1a8   : > { %v643_v21 = vsel %vm246_vm0, %v636_v4, %v637_v14  ;;  %v645_v52 = vsel %vm639_vm8, %v633_v54, %v637_v14  ;;  %v2108_v17 = vld [vmem:[#allocation2 + $0xd8] sm:$0xf0] }
 0x1a9   : > { %1739 = vmatpush.bf16.msrb.mxu0 %v2007_v31  ;;  %v644_v26 = vsel %vm639_vm8, %v2447_v13, %v643_v21  ;;  %653 = vst [vmem:[#allocation2 + $0xa4] sm:$0x3] %v645_v52  ;;  %v687_v38 = vsel %vm246_vm0, %v680_v32, %v681_v45  ;;  %v689_v56 = vsel %vm683_vm11, %v677_v43, %v681_v45  ;;  %v2107_v55 = vld [vmem:[#allocation2 + $0xd0] sm:$0xf0]  ;;  %v1980_v20 = vld [vmem:[#allocation2 + $0xd4] sm:$0xf0]  ;;  %vm2875_vm0 = vmmov %vm2874_vm1 }
 0x1aa   : > { %1752 = vmatpush.bf16.msrb.mxu1 %v2011_v53  ;;  %v1987_v47 = vor.u32 %v2108_v17, %v1986_v12  ;;  %652 = vst [vmem:[#allocation2 + $0x9c] sm:$0x33] %v644_v26  ;;  %v688_v4 = vsel %vm683_vm11, %v2497_v22, %v687_v38  ;;  %v1979_v37 = vor.u32 %v2107_v55, %v1978_v62  ;;  %v1950_v13 = vld [vmem:[#allocation2 + $0x80] sm:$0xf]  ;;  %v2097_v39 = vld [vmem:[#allocation2 + $0x84] sm:$0xf]  ;;  %vm2876_vm8 = vmmov %vm2875_vm0 }
 0x1ab   : > { %1765 = vmatpush.bf16.msrb.mxu2 %v2015_v41  ;;  %v1983_v18 = vor.u32 %v2104_v1, %v1980_v20  ;;  %696 = vst [vmem:[#allocation2 + $0x9c] sm:$0xcc] %v688_v4  ;;  %v1958_v3 = vld [vmem:[#allocation2 + $0x88] sm:$0xf]  ;;  %v2094_v22 = vld [vmem:[#allocation2 + $0x68] sm:$0xf0]  ;;  %vm2877_vm9 = vmmov %vm2875_vm0 }
 0x1ac   : > { %697 = vst [vmem:[#allocation2 + $0xa4] sm:$0xc] %v689_v56  ;;  %v1931_v2 = vor.u32 %v2094_v22, %v1930_v5  ;;  %vm1783_vm11 = vcmp.gt.f32.partialorder %v1782_v44, 0.0 }
 0x1ad   : > { %1740 = vmatpush.bf16.msrb.mxu0 %v1979_v37  ;;  %v1784_v48 = vsel %vm1783_vm11, 1, %v2203_v35 }
 0x1ae   : > { %1753 = vmatpush.bf16.msrb.mxu1 %v1983_v18  ;;  %v1785_v61 = vperm.slane %v1784_v48, 0  ;;  %v1786_v15 = vperm.slane %v1784_v48, 1  ;;  %v1787_v29 = vperm.slane %v1784_v48, 2  ;;  %v1788_v31 = vperm.slane %v1784_v48, 3 }
 0x1af   : > { %1766 = vmatpush.bf16.msrb.mxu2 %v1987_v47  ;;  %v1789_v38 = vperm.slane %v1784_v48, 4  ;;  %v1790_v56 = vperm.slane %v1784_v48, 5 }
 0x1b0   : > { %vm1792_vm2 = vcmp.eq.s32.totalorder %v1785_v61, 1  ;;  %vm1793_vm3 = vcmp.eq.s32.totalorder %v1786_v15, 1  ;;  %vm1794_vm4 = vcmp.eq.s32.totalorder %v1787_v29, 1  ;;  %vm1795_vm5 = vcmp.eq.s32.totalorder %v1788_v31, 1 }
 0x1b1   : > { %vm1796_vm7 = vcmp.eq.s32.totalorder %v1789_v38, 1  ;;  %vm1797_vm6 = vcmp.eq.s32.totalorder %v1790_v56, 1 }
 0x1b2   : > { %v2100_v34 = vld [vmem:[#allocation2 + $0x98] sm:$0xf0]  ;;  %v1952_v32 = vld [vmem:[#allocation2 + $0x9c] sm:$0xf0] }
 0x1b3   : > { %v2101_v10 = vld [vmem:[#allocation2 + $0xa0] sm:$0xf0]  ;;  %v1951_v58 = vor.u32 %v2100_v34, %v1950_v13  ;;  %v1955_v23 = vor.u32 %v2097_v39, %v1952_v32  ;;  %v1791_v39 = vperm.slane %v1784_v48, 6 }
 0x1b4   : > { %v1959_v42 = vor.u32 %v2101_v10, %v1958_v3 }
 0x1b5   : > { %1741 = vmatpush.bf16.msrb.mxu0 %v1951_v58  ;;  %1754 = vmatpush.bf16.msrb.mxu1 %v1955_v23  ;;  %vm1798_vm10 = vcmp.eq.s32.totalorder %v1791_v39, 1 }
 0x1b6   : > { %1767 = vmatpush.bf16.msrb.mxu2 %v1959_v42 }
 0x1b9   : > { %1742 = vmatpush.bf16.msrb.mxu0 %v1923_v50  ;;  %1755 = vmatpush.bf16.msrb.mxu1 %v1927_v36 }
 0x1ba   : > { %1768 = vmatpush.bf16.msrb.mxu2 %v1931_v2 }
 0x1bd   : > { %1743 = vmatpush.bf16.msrb.mxu0 %v1895_v57  ;;  %1756 = vmatpush.bf16.msrb.mxu1 %v1899_v27 }
 0x1be   : > { %1769 = vmatpush.bf16.msrb.mxu2 %v1903_v28 }
 0x1c0   : > { %2076 = vmatmul.msk.bf16.vlgmr.msrb.gmra.mxu0 %vm2875_vm0, %v2800_v19  ;;  %2077 = vmatmul.msk.bf16.vlgmr.msrb.gmra.mxu1 %vm2876_vm8, %v2800_v19 }
 0x1c1   : > { %2078 = vmatmul.msk.bf16.vlgmr.msrb.gmra.mxu2 %vm2877_vm9, %v2800_v19 }
 0x1fe   : > { %v1411_v0 = vpop.permute.xlu2 %1410 }
 0x21d   : > { %v1693_v25 = vpop.f32.mrf.mxu0 }
 0x21e   : > { %v1694_v8 = vadd.f32 %v1693_v25, %v1411_v0 }
 0x220   : > { %v1706_v7 = vpop.f32.mrf.mxu1  ;;  %v1775_v30 = vmax.f32 %v1694_v8, 0.0 }
 0x221   : > { %v1707_v9 = vadd.f32 %v1706_v7, %v1411_v0 }
 0x222   : > { %v1799_v19 = vsel %vm1792_vm2, %v1775_v30, 0.0 }
 0x223   : > { %v1776_v60 = vmax.f32 %v1707_v9, 0.0 }
 0x225   : > { %v1800_v16 = vsel %vm1793_vm3, %v1776_v60, 0.0  ;;  %v1695_v35 = vpop.f32.mrf.mxu0  ;;  %v1719_v54 = vpop.f32.mrf.mxu2 }
 0x226   : > { %v1806_v53 = vpack.c.bf16 %v1800_v16, %v1799_v19  ;;  %v1720_v43 = vadd.f32 %v1719_v54, %v1411_v0 }
 0x227   : > { %v1732_v14 = vpop.f32.mrf.mxu3 }
 0x228   : > { %1810 = vst [vmem:[%s2853_s6] sm:$0xff] %v1806_v53  ;;  %v1733_v41 = vadd.f32 %v1732_v14, %v1411_v0  ;;  %v1708_v45 = vpop.f32.mrf.mxu1  ;;  %v1777_v62 = vmax.f32 %v1720_v43, 0.0 }
 0x22a   : > { %v1778_v21 = vmax.f32 %v1733_v41, 0.0  ;;  %v1801_v52 = vsel %vm1794_vm4, %v1777_v62, 0.0 }
 0x22c   : > { %v1802_v12 = vsel %vm1795_vm5, %v1778_v21, 0.0 }
 0x22d   : > { %v1807_v17 = vpack.c.bf16 %v1802_v12, %v1801_v52  ;;  %v1721_v1 = vpop.f32.mrf.mxu2 }
 0x22f   : > { %1811 = vst [vmem:[%s2853_s6 + $0x8] sm:$0xff] %v1807_v17  ;;  %v1734_v26 = vpop.f32.mrf.mxu3 }
 0x23d   : > { %v1745_v47 = vpop.f32.mrf.mxu0  ;;  %v1758_v55 = vpop.f32.mrf.mxu1 }
 0x23e   : > { %v1746_v20 = vadd.f32 %v1745_v47, %v1411_v0  ;;  %v1759_v4 = vadd.f32 %v1758_v55, %v1411_v0 }
 0x240   : > { %v1779_v37 = vmax.f32 %v1746_v20, 0.0  ;;  %v1780_v18 = vmax.f32 %v1759_v4, 0.0 }
 0x242   : > { %v1803_v13 = vsel %vm1796_vm7, %v1779_v37, 0.0  ;;  %v1804_v34 = vsel %vm1797_vm6, %v1780_v18, 0.0 }
 0x243   : > { %v1808_v32 = vpack.c.bf16 %v1804_v34, %v1803_v13 }
 0x244   : > { %v1771_v3 = vpop.f32.mrf.mxu2 }
 0x245   : > { %1812 = vst [vmem:[%s2853_s6 + $0x10] sm:$0xff] %v1808_v32  ;;  %v1772_v10 = vadd.f32 %v1771_v3, %v1411_v0  ;;  %v1747_v58 = vpop.f32.mrf.mxu0  ;;  %v1760_v23 = vpop.f32.mrf.mxu1 }
 0x247   : > { %v1781_v42 = vmax.f32 %v1772_v10, 0.0 }
 0x249   : > { %v1805_v59 = vsel %vm1798_vm10, %v1781_v42, 0.0 }
 0x24a   : > { %v1809_v11 = vpack.c.bf16 %v1805_v59, %v1805_v59 }
 0x24c   : > { %1813 = vst [vmem:[%s2853_s6 + $0x18] sm:$0xf] %v1809_v11  ;;  %v1773_v22 = vpop.f32.mrf.mxu2 }
 0x24d PF: > { %s14_s15 = sadd.s32 1, %s2175_s15  }
 0x24e   : > { %p11_p4 = scmp.ge.s32.totalorder %s14_s15, 4  }
 0x250   :  { %13 = sbr.rel (!%p11_p4) target bundleno = 1 (0x1), region = 106 }

</bundles_post_ra>
